<compile_context>
chip_gen: v7x
topology: tpu7x:2x2x1
jax: 0.10.0
libtpu: 0.0.40
codegen_flags: <defaults>
</compile_context>

<pallas_src>
import functools

import jax
import jax.numpy as jnp
import numpy as np
from jax import lax
from jax.experimental import pallas as pl
from jax.experimental.pallas import tpu as pltpu  # noqa: F401  (TPU backend)


# --------------------------------------------------------------------------
# In-kernel helpers (pure value-level math on loaded tiles)
# --------------------------------------------------------------------------
def _bottom_k_mean(q, toks_flat, *, num_tokens, k):
    """Per-row mean of the k tokens LEAST cosine-similar to that row's query.

    q         : (B, D)    query features (CLS / EOS token), one per batch row
    toks_flat : (B*L, D)  candidate tokens, batch-major flattened
    returns   : (B, D)

    Similarities, validity masks and one-hots are (B, B*L) with the token axis
    in lanes; cross-batch token columns are disabled by a block-diagonal
    validity mask.  The gather of the k selected tokens is one MXU matmul.
    """
    B, D = q.shape
    BL = toks_flat.shape[0]
    L = num_tokens
    eps = jnp.float32(1e-8)
    inf = jnp.float32(jnp.inf)

    # Gram and per-token squared norms in lane-major layout straight off the
    # MXU (contraction over last dims; no (D, B*L) transpose is materialized).
    dots = jnp.einsum("md,nd->mn", q, toks_flat,
                      preferred_element_type=jnp.float32)                  # (B, B*L)
    tok_sq = jnp.einsum("md,nd->mn", jnp.ones((1, D), jnp.float32),
                        toks_flat * toks_flat,
                        preferred_element_type=jnp.float32)                # (1, B*L)
    q_norm = jnp.sqrt(jnp.sum(q * q, axis=-1, keepdims=True))              # (B, 1)
    # F.cosine_similarity: dot / max(|q| * |t|, eps)
    sims = dots / jnp.maximum(q_norm * jnp.sqrt(tok_sq), eps)              # (B, B*L)

    row = lax.broadcasted_iota(jnp.int32, (B, BL), 0)
    col = lax.broadcasted_iota(jnp.int32, (B, BL), 1)
    avail = jnp.logical_and(col >= row * L, col < (row + 1) * L)           # block-diag

    sel_mask = jnp.zeros((B, BL), dtype=jnp.bool_)
    # k is small & static -> unrolled iterative argmin == torch.topk(largest=False)
    # (ties broken toward the lowest index; torch's tie order is unspecified).
    for _ in range(k):
        masked = jnp.where(avail, sims, inf)
        min_val = jnp.min(masked, axis=-1, keepdims=True)                  # (B, 1)
        first = jnp.min(jnp.where(masked == min_val, col, BL),
                        axis=-1, keepdims=True)                            # (B, 1)
        hit = col == first                                                 # (B, B*L)
        sel_mask = jnp.logical_or(sel_mask, hit)
        avail = jnp.logical_and(avail, jnp.logical_not(hit))

    # Weighted gather of the k selected tokens on the MXU; 1/k mean factor is
    # folded into the selection weights.
    sel = jnp.where(sel_mask, jnp.float32(1.0 / k), jnp.float32(0.0))
    return jnp.dot(sel, toks_flat, preferred_element_type=jnp.float32)     # (B, D)


def _sq_norm(parts):
    acc = jnp.sum(parts[0] * parts[0], axis=-1, keepdims=True)
    for p in parts[1:]:
        acc = acc + jnp.sum(p * p, axis=-1, keepdims=True)
    return acc                                                             # (B, 1)


def _itc_loss(i_parts, t_parts, scale):
    """CLIP-style symmetric InfoNCE on (conceptually concatenated) features.

    i_parts / t_parts are tuples of (B, D_p) blocks representing
    concat(parts, axis=-1); the concatenation is never materialized: the
    combined L2 norm and the combined Gram matrix are assembled per part.
    Both softmax directions are computed on the same (B, B) logits tile
    (rows: image->text via lane LSE; columns: text->image via sublane LSE),
    so logits.T is never formed.  Returns a (1, 1) float32 loss.
    """
    eps = jnp.float32(1e-12)
    inv_i = jnp.float32(1.0) / jnp.maximum(jnp.sqrt(_sq_norm(i_parts)), eps)  # (B, 1)
    inv_t = jnp.float32(1.0) / jnp.maximum(jnp.sqrt(_sq_norm(t_parts)), eps)  # (B, 1)

    logits = None
    for ip, tp in zip(i_parts, t_parts):
        part = jnp.einsum("md,nd->mn", ip * inv_i, tp * inv_t,
                          preferred_element_type=jnp.float32)              # (B, B)
        logits = part if logits is None else logits + part
    logits = logits * jnp.float32(scale)      # rows: image -> text

    B = logits.shape[0]
    eye = (lax.broadcasted_iota(jnp.int32, (B, B), 0)
           == lax.broadcasted_iota(jnp.int32, (B, B), 1))
    diag = jnp.where(eye, logits, jnp.float32(0.0))

    # image -> text: softmax over rows (lane axis).
    m_r = jnp.max(logits, axis=-1, keepdims=True)                          # (B, 1)
    lse_r = jnp.log(jnp.sum(jnp.exp(logits - m_r), axis=-1, keepdims=True)) + m_r
    loss_r = jnp.sum(lse_r - jnp.sum(diag, axis=-1, keepdims=True),
                     axis=0, keepdims=True)                                # (1, 1)

    # text -> image: softmax over columns (sublane axis), no transpose.
    m_c = jnp.max(logits, axis=0, keepdims=True)                           # (1, B)
    lse_c = jnp.log(jnp.sum(jnp.exp(logits - m_c), axis=0, keepdims=True)) + m_c
    loss_c = jnp.sum(lse_c - jnp.sum(diag, axis=0, keepdims=True),
                     axis=1, keepdims=True)                                # (1, 1)

    return (loss_r + loss_c) * jnp.float32(1.0 / (2 * B))


# --------------------------------------------------------------------------
# Fused kernel: bottom-k pooling for both modalities + both ITC losses
# --------------------------------------------------------------------------
def _lg_mgc_head_kernel(i_ref, t_ref, img_ref, txt_ref, itc_ref, comb_ref,
                        *, scale, image_k, text_k, l_img, l_txt):
    i_feats = i_ref[...].astype(jnp.float32)      # (B, D)
    t_feats = t_ref[...].astype(jnp.float32)      # (B, D)
    img_toks = img_ref[...].astype(jnp.float32)   # (B*L_img, D)
    txt_toks = txt_ref[...].astype(jnp.float32)   # (B*T, D)

    image_n_top_k = _bottom_k_mean(i_feats, img_toks, num_tokens=l_img, k=image_k)
    text_n_top_k = _bottom_k_mean(t_feats, txt_toks, num_tokens=l_txt, k=text_k)

    # 'itc' loss on the CLS / EOS features alone.
    itc_ref[...] = _itc_loss((i_feats,), (t_feats,), scale)
    # 'top' loss on cat([feat, bottom-k mean], -1): concat folded into the loss.
    comb_ref[...] = _itc_loss((i_feats, image_n_top_k),
                              (t_feats, text_n_top_k), scale)


def lg_mgc_head_losses(i_feats, t_feats, image_toks, text_toks, *,
                       logit_scale, image_k, text_k):
    """One fused pallas_call producing (itc_loss, itc_combined_loss)."""
    B, D = i_feats.shape
    _, L_img, _ = image_toks.shape
    _, T, _ = text_toks.shape
    assert image_k <= L_img and text_k <= T, "top-k must not exceed token count"

    img_flat = image_toks.reshape(B * L_img, D)   # batch-major flatten (free in XLA)
    txt_flat = text_toks.reshape(B * T, D)

    kernel = functools.partial(_lg_mgc_head_kernel, scale=float(logit_scale),
                               image_k=int(image_k), text_k=int(text_k),
                               l_img=int(L_img), l_txt=int(T))
    itc_loss, itc_combined = pl.pallas_call(
        kernel,
        out_shape=(jax.ShapeDtypeStruct((1, 1), jnp.float32),
                   jax.ShapeDtypeStruct((1, 1), jnp.float32)),
        in_specs=[
            pl.BlockSpec((B, D), lambda: (0, 0)),
            pl.BlockSpec((B, D), lambda: (0, 0)),
            pl.BlockSpec((B * L_img, D), lambda: (0, 0)),
            pl.BlockSpec((B * T, D), lambda: (0, 0)),
        ],
        out_specs=(
            pl.BlockSpec((1, 1), lambda: (0, 0)),
            pl.BlockSpec((1, 1), lambda: (0, 0)),
        ),
    )(i_feats, t_feats, img_flat, txt_flat)
    return itc_loss[0, 0], itc_combined[0, 0]


# --------------------------------------------------------------------------
# LG_MGC.forward head (backbone-output glue in plain JAX, hot path fused above)
# --------------------------------------------------------------------------
def lg_mgc_forward(
    image_feats_full,   # (B, 1+L_img, D)  output of base_model.encode_image
    text_feats,         # (B, T, D)        output of base_model.encode_text
    caption_ids,        # (B, T) int32
    *,
    temperature=0.02,
    image_k=3,
    text_k=3,
    loss_names="itc+top",
):
    current_task = [l.strip() for l in loss_names.split("+")]
    logit_scale = 1.0 / temperature
    B = text_feats.shape[0]

    # Backbone-output glue: CLS token, patch tokens, EOS-token gather.
    i_feats = image_feats_full[:, 0, :]
    image_toks = image_feats_full[:, 1:, :]
    eos_idx = jnp.argmax(caption_ids, axis=-1)
    t_feats = text_feats[jnp.arange(B), eos_idx]

    ret = {"temperature": jnp.float32(1.0 / logit_scale)}

    if ("itc" in current_task) or ("top" in current_task):
        itc_loss, itc_combined = lg_mgc_head_losses(
            i_feats, t_feats, image_toks, text_feats,
            logit_scale=logit_scale, image_k=image_k, text_k=text_k)
        if "itc" in current_task:
            ret["itc_loss"] = itc_loss
        if "top" in current_task:
            ret["itc_combined_loss"] = itc_combined
    # TODO(synk): 'pred' branch requires the frozen DALLE prior.sample() and the
    #             CLIP vision_proj weights (external pretrained networks).
    # TODO(synk): 'topsm' branch requires TopKPooling_1, whose definition is not
    #             provided in the reference.
    return ret


# --------------------------------------------------------------------------
# Pure-JAX reference (for a silent correctness check in __main__)
# --------------------------------------------------------------------------
def _ref_losses(i_feats, t_feats, image_toks, text_toks, scale, image_k, text_k):
    def bottom_k(q, toks, k):
        dots = jnp.einsum("bd,bld->bl", q, toks)
        qn = jnp.sqrt(jnp.sum(q * q, -1, keepdims=True))
        tn = jnp.sqrt(jnp.sum(toks * toks, -1))
        sims = dots / jnp.maximum(qn * tn, 1e-8)
        idx = jnp.argsort(sims, axis=-1)[:, :k]
        sel = jnp.take_along_axis(toks, idx[..., None], axis=1)
        return jnp.mean(sel, axis=1)

    def itc(a, b):
        an = a / jnp.linalg.norm(a, axis=-1, keepdims=True)
        bn = b / jnp.linalg.norm(b, axis=-1, keepdims=True)
        logits = scale * an @ bn.T
        lab = jnp.arange(a.shape[0])
        li = -jnp.mean(jax.nn.log_softmax(logits, -1)[lab, lab])
        lt = -jnp.mean(jax.nn.log_softmax(logits.T, -1)[lab, lab])
        return (li + lt) / 2

    pi = bottom_k(i_feats, image_toks, image_k)
    pt = bottom_k(t_feats, text_toks, text_k)
    return (itc(i_feats, t_feats),
            itc(jnp.concatenate([i_feats, pi], -1),
                jnp.concatenate([t_feats, pt], -1)))


if __name__ == "__main__":
    key = jax.random.PRNGKey(0)
    B, L_img, T, D = 8, 16, 8, 32
    k1, k2, k3 = jax.random.split(key, 3)

    # Synthetic stand-ins for the CLIP backbone outputs.
    image_feats_full = jax.random.normal(k1, (B, 1 + L_img, D), dtype=jnp.float32)
    text_feats = jax.random.normal(k2, (B, T, D), dtype=jnp.float32)
    caption_ids = jax.random.randint(k3, (B, T), 1, 1000, dtype=jnp.int32)

    ret = lg_mgc_forward(image_feats_full, text_feats, caption_ids)
    jax.block_until_ready(ret)

    # Silent correctness check against a pure-JAX reference of the head math.
    i_feats = image_feats_full[:, 0, :]
    image_toks = image_feats_full[:, 1:, :]
    eos_idx = jnp.argmax(caption_ids, axis=-1)
    t_feats = text_feats[jnp.arange(B), eos_idx]
    ref_itc, ref_top = _ref_losses(i_feats, t_feats, image_toks, text_feats,
                                   1.0 / 0.02, 3, 3)
    np.testing.assert_allclose(float(ret["itc_loss"]), float(ref_itc),
                               rtol=1e-3, atol=1e-3)
    np.testing.assert_allclose(float(ret["itc_combined_loss"]), float(ref_top),
                               rtol=1e-3, atol=1e-3)

    print("KERNEL_OK")
</pallas_src>

<mosaic_0001>
module attributes {stable_mosaic.version = 11 : i64} {
  func.func @_lg_mgc_head_kernel(%arg0: memref<8x32xf32, #tpu.memory_space<vmem>>, %arg1: memref<8x32xf32, #tpu.memory_space<vmem>>, %arg2: memref<128x32xf32, #tpu.memory_space<vmem>>, %arg3: memref<64x32xf32, #tpu.memory_space<vmem>>, %arg4: memref<1x1xf32, #tpu.memory_space<vmem>>, %arg5: memref<1x1xf32, #tpu.memory_space<vmem>>) attributes {dimension_semantics = [], scalar_prefetch = 0 : i64, scratch_operands = 0 : i64, tpu.core_type = #tpu.core_type<tc>} {
    %c0 = arith.constant 0 : index
    %c0_0 = arith.constant 0 : index
    %0 = vector.load %arg0[%c0, %c0_0] : memref<8x32xf32, #tpu.memory_space<vmem>>, vector<8x32xf32>
    %c0_1 = arith.constant 0 : index
    %c0_2 = arith.constant 0 : index
    %1 = vector.load %arg1[%c0_1, %c0_2] : memref<8x32xf32, #tpu.memory_space<vmem>>, vector<8x32xf32>
    %c0_3 = arith.constant 0 : index
    %c0_4 = arith.constant 0 : index
    %2 = vector.load %arg2[%c0_3, %c0_4] : memref<128x32xf32, #tpu.memory_space<vmem>>, vector<128x32xf32>
    %c0_5 = arith.constant 0 : index
    %c0_6 = arith.constant 0 : index
    %3 = vector.load %arg3[%c0_5, %c0_6] : memref<64x32xf32, #tpu.memory_space<vmem>>, vector<64x32xf32>
    "tpu.trace_start"() <{level = 10 : i32, message = "md,nd->mn"}> : () -> ()
    %cst = arith.constant dense<0.000000e+00> : vector<8x128xf32>
    %4 = tpu.matmul %0, %2, %cst {dimension_numbers = #tpu.dot_dimension_numbers<[1], [1], [0], [0], [0, 0, 1, 0], [], []>} : vector<8x32xf32>, vector<128x32xf32>, vector<8x128xf32> -> vector<8x128xf32>
    %cst_7 = arith.constant 1.000000e+00 : f32
    "tpu.trace_stop"() : () -> ()
    %5 = vector.broadcast %cst_7 : f32 to vector<1x32xf32>
    %6 = arith.mulf %2, %2 : vector<128x32xf32>
    "tpu.trace_start"() <{level = 10 : i32, message = "md,nd->mn"}> : () -> ()
    %cst_8 = arith.constant dense<0.000000e+00> : vector<1x128xf32>
    %7 = tpu.matmul %5, %6, %cst_8 {dimension_numbers = #tpu.dot_dimension_numbers<[1], [1], [0], [0], [0, 0, 1, 0], [], []>} : vector<1x32xf32>, vector<128x32xf32>, vector<1x128xf32> -> vector<1x128xf32>
    "tpu.trace_stop"() : () -> ()
    %8 = arith.mulf %0, %0 : vector<8x32xf32>
    %cst_9 = arith.constant dense<0.000000e+00> : vector<8xf32>
    %9 = vector.multi_reduction <add>, %8, %cst_9 [1] : vector<8x32xf32> to vector<8xf32>
    %10 = vector.shape_cast %9 : vector<8xf32> to vector<8x1xf32>
    %11 = math.sqrt %10 : vector<8x1xf32>
    %12 = math.sqrt %7 : vector<1x128xf32>
    %13 = vector.broadcast %11 : vector<8x1xf32> to vector<8x128xf32>
    %14 = vector.broadcast %12 : vector<1x128xf32> to vector<8x128xf32>
    %15 = arith.mulf %13, %14 : vector<8x128xf32>
    %cst_10 = arith.constant 9.99999993E-9 : f32
    %16 = vector.broadcast %cst_10 : f32 to vector<8x128xf32>
    %17 = arith.maximumf %15, %16 : vector<8x128xf32>
    %18 = arith.divf %4, %17 : vector<8x128xf32>
    %19 = tpu.iota {dimensions = array<i32: 0>} : vector<8x128xi32>
    %20 = tpu.iota {dimensions = array<i32: 1>} : vector<8x128xi32>
    %c16_i32 = arith.constant 16 : i32
    %21 = vector.broadcast %c16_i32 : i32 to vector<8x128xi32>
    %22 = arith.muli %19, %21 : vector<8x128xi32>
    %23 = arith.cmpi sge, %20, %22 : vector<8x128xi32>
    %c1_i32 = arith.constant 1 : i32
    %24 = vector.broadcast %c1_i32 : i32 to vector<8x128xi32>
    %25 = arith.addi %19, %24 : vector<8x128xi32>
    %c16_i32_11 = arith.constant 16 : i32
    %26 = vector.broadcast %c16_i32_11 : i32 to vector<8x128xi32>
    %27 = arith.muli %25, %26 : vector<8x128xi32>
    %28 = arith.cmpi slt, %20, %27 : vector<8x128xi32>
    %29 = arith.andi %23, %28 : vector<8x128xi1>
    %false = arith.constant false
    %30 = vector.broadcast %false : i1 to vector<8x128xi1>
    %cst_12 = arith.constant 0x7F800000 : f32
    %31 = vector.broadcast %cst_12 : f32 to vector<8x128xf32>
    %32 = arith.select %29, %18, %31 : vector<8x128xi1>, vector<8x128xf32>
    %cst_13 = arith.constant dense<0x7F800000> : vector<8xf32>
    %33 = vector.multi_reduction <minimumf>, %32, %cst_13 [1] : vector<8x128xf32> to vector<8xf32>
    %34 = vector.shape_cast %33 : vector<8xf32> to vector<8x1xf32>
    %35 = vector.broadcast %34 : vector<8x1xf32> to vector<8x128xf32>
    %36 = arith.cmpf oeq, %32, %35 : vector<8x128xf32>
    %c128_i32 = arith.constant 128 : i32
    %37 = vector.broadcast %c128_i32 : i32 to vector<8x128xi32>
    %38 = arith.select %36, %20, %37 : vector<8x128xi1>, vector<8x128xi32>
    %cst_14 = arith.constant dense<2147483647> : vector<8xi32>
    %39 = vector.multi_reduction <minsi>, %38, %cst_14 [1] : vector<8x128xi32> to vector<8xi32>
    %40 = vector.shape_cast %39 : vector<8xi32> to vector<8x1xi32>
    %41 = vector.broadcast %40 : vector<8x1xi32> to vector<8x128xi32>
    %42 = arith.cmpi eq, %20, %41 : vector<8x128xi32>
    %43 = arith.ori %30, %42 : vector<8x128xi1>
    %cst_15 = arith.constant dense<true> : vector<8x128xi1>
    %44 = arith.xori %42, %cst_15 : vector<8x128xi1>
    %45 = arith.andi %29, %44 : vector<8x128xi1>
    %cst_16 = arith.constant 0x7F800000 : f32
    %46 = vector.broadcast %cst_16 : f32 to vector<8x128xf32>
    %47 = arith.select %45, %18, %46 : vector<8x128xi1>, vector<8x128xf32>
    %cst_17 = arith.constant dense<0x7F800000> : vector<8xf32>
    %48 = vector.multi_reduction <minimumf>, %47, %cst_17 [1] : vector<8x128xf32> to vector<8xf32>
    %49 = vector.shape_cast %48 : vector<8xf32> to vector<8x1xf32>
    %50 = vector.broadcast %49 : vector<8x1xf32> to vector<8x128xf32>
    %51 = arith.cmpf oeq, %47, %50 : vector<8x128xf32>
    %c128_i32_18 = arith.constant 128 : i32
    %52 = vector.broadcast %c128_i32_18 : i32 to vector<8x128xi32>
    %53 = arith.select %51, %20, %52 : vector<8x128xi1>, vector<8x128xi32>
    %cst_19 = arith.constant dense<2147483647> : vector<8xi32>
    %54 = vector.multi_reduction <minsi>, %53, %cst_19 [1] : vector<8x128xi32> to vector<8xi32>
    %55 = vector.shape_cast %54 : vector<8xi32> to vector<8x1xi32>
    %56 = vector.broadcast %55 : vector<8x1xi32> to vector<8x128xi32>
    %57 = arith.cmpi eq, %20, %56 : vector<8x128xi32>
    %58 = arith.ori %43, %57 : vector<8x128xi1>
    %cst_20 = arith.constant dense<true> : vector<8x128xi1>
    %59 = arith.xori %57, %cst_20 : vector<8x128xi1>
    %60 = arith.andi %45, %59 : vector<8x128xi1>
    %cst_21 = arith.constant 0x7F800000 : f32
    %61 = vector.broadcast %cst_21 : f32 to vector<8x128xf32>
    %62 = arith.select %60, %18, %61 : vector<8x128xi1>, vector<8x128xf32>
    %cst_22 = arith.constant dense<0x7F800000> : vector<8xf32>
    %63 = vector.multi_reduction <minimumf>, %62, %cst_22 [1] : vector<8x128xf32> to vector<8xf32>
    %64 = vector.shape_cast %63 : vector<8xf32> to vector<8x1xf32>
    %65 = vector.broadcast %64 : vector<8x1xf32> to vector<8x128xf32>
    %66 = arith.cmpf oeq, %62, %65 : vector<8x128xf32>
    %c128_i32_23 = arith.constant 128 : i32
    %67 = vector.broadcast %c128_i32_23 : i32 to vector<8x128xi32>
    %68 = arith.select %66, %20, %67 : vector<8x128xi1>, vector<8x128xi32>
    %cst_24 = arith.constant dense<2147483647> : vector<8xi32>
    %69 = vector.multi_reduction <minsi>, %68, %cst_24 [1] : vector<8x128xi32> to vector<8xi32>
    %70 = vector.shape_cast %69 : vector<8xi32> to vector<8x1xi32>
    %71 = vector.broadcast %70 : vector<8x1xi32> to vector<8x128xi32>
    %72 = arith.cmpi eq, %20, %71 : vector<8x128xi32>
    %73 = arith.ori %58, %72 : vector<8x128xi1>
    %cst_25 = arith.constant 0.333333343 : f32
    %cst_26 = arith.constant 0.000000e+00 : f32
    %74 = vector.broadcast %cst_25 : f32 to vector<8x128xf32>
    %75 = vector.broadcast %cst_26 : f32 to vector<8x128xf32>
    %76 = arith.select %73, %74, %75 : vector<8x128xi1>, vector<8x128xf32>
    %cst_27 = arith.constant dense<0.000000e+00> : vector<8x32xf32>
    %77 = tpu.matmul %76, %2, %cst_27 {dimension_numbers = #tpu.dot_dimension_numbers<[1], [0], [0], [1], [0, 0, 1, 1], [], []>} : vector<8x128xf32>, vector<128x32xf32>, vector<8x32xf32> -> vector<8x32xf32>
    "tpu.trace_start"() <{level = 10 : i32, message = "md,nd->mn"}> : () -> ()
    %cst_28 = arith.constant dense<0.000000e+00> : vector<8x64xf32>
    %78 = tpu.matmul %1, %3, %cst_28 {dimension_numbers = #tpu.dot_dimension_numbers<[1], [1], [0], [0], [0, 0, 1, 0], [], []>} : vector<8x32xf32>, vector<64x32xf32>, vector<8x64xf32> -> vector<8x64xf32>
    %cst_29 = arith.constant 1.000000e+00 : f32
    "tpu.trace_stop"() : () -> ()
    %79 = vector.broadcast %cst_29 : f32 to vector<1x32xf32>
    %80 = arith.mulf %3, %3 : vector<64x32xf32>
    "tpu.trace_start"() <{level = 10 : i32, message = "md,nd->mn"}> : () -> ()
    %cst_30 = arith.constant dense<0.000000e+00> : vector<1x64xf32>
    %81 = tpu.matmul %79, %80, %cst_30 {dimension_numbers = #tpu.dot_dimension_numbers<[1], [1], [0], [0], [0, 0, 1, 0], [], []>} : vector<1x32xf32>, vector<64x32xf32>, vector<1x64xf32> -> vector<1x64xf32>
    "tpu.trace_stop"() : () -> ()
    %82 = arith.mulf %1, %1 : vector<8x32xf32>
    %cst_31 = arith.constant dense<0.000000e+00> : vector<8xf32>
    %83 = vector.multi_reduction <add>, %82, %cst_31 [1] : vector<8x32xf32> to vector<8xf32>
    %84 = vector.shape_cast %83 : vector<8xf32> to vector<8x1xf32>
    %85 = math.sqrt %84 : vector<8x1xf32>
    %86 = math.sqrt %81 : vector<1x64xf32>
    %87 = vector.broadcast %85 : vector<8x1xf32> to vector<8x64xf32>
    %88 = vector.broadcast %86 : vector<1x64xf32> to vector<8x64xf32>
    %89 = arith.mulf %87, %88 : vector<8x64xf32>
    %cst_32 = arith.constant 9.99999993E-9 : f32
    %90 = vector.broadcast %cst_32 : f32 to vector<8x64xf32>
    %91 = arith.maximumf %89, %90 : vector<8x64xf32>
    %92 = arith.divf %78, %91 : vector<8x64xf32>
    %93 = tpu.iota {dimensions = array<i32: 0>} : vector<8x64xi32>
    %94 = tpu.iota {dimensions = array<i32: 1>} : vector<8x64xi32>
    %c8_i32 = arith.constant 8 : i32
    %95 = vector.broadcast %c8_i32 : i32 to vector<8x64xi32>
    %96 = arith.muli %93, %95 : vector<8x64xi32>
    %97 = arith.cmpi sge, %94, %96 : vector<8x64xi32>
    %c1_i32_33 = arith.constant 1 : i32
    %98 = vector.broadcast %c1_i32_33 : i32 to vector<8x64xi32>
    %99 = arith.addi %93, %98 : vector<8x64xi32>
    %c8_i32_34 = arith.constant 8 : i32
    %100 = vector.broadcast %c8_i32_34 : i32 to vector<8x64xi32>
    %101 = arith.muli %99, %100 : vector<8x64xi32>
    %102 = arith.cmpi slt, %94, %101 : vector<8x64xi32>
    %103 = arith.andi %97, %102 : vector<8x64xi1>
    %false_35 = arith.constant false
    %104 = vector.broadcast %false_35 : i1 to vector<8x64xi1>
    %cst_36 = arith.constant 0x7F800000 : f32
    %105 = vector.broadcast %cst_36 : f32 to vector<8x64xf32>
    %106 = arith.select %103, %92, %105 : vector<8x64xi1>, vector<8x64xf32>
    %cst_37 = arith.constant dense<0x7F800000> : vector<8xf32>
    %107 = vector.multi_reduction <minimumf>, %106, %cst_37 [1] : vector<8x64xf32> to vector<8xf32>
    %108 = vector.shape_cast %107 : vector<8xf32> to vector<8x1xf32>
    %109 = vector.broadcast %108 : vector<8x1xf32> to vector<8x64xf32>
    %110 = arith.cmpf oeq, %106, %109 : vector<8x64xf32>
    %c64_i32 = arith.constant 64 : i32
    %111 = vector.broadcast %c64_i32 : i32 to vector<8x64xi32>
    %112 = arith.select %110, %94, %111 : vector<8x64xi1>, vector<8x64xi32>
    %cst_38 = arith.constant dense<2147483647> : vector<8xi32>
    %113 = vector.multi_reduction <minsi>, %112, %cst_38 [1] : vector<8x64xi32> to vector<8xi32>
    %114 = vector.shape_cast %113 : vector<8xi32> to vector<8x1xi32>
    %115 = vector.broadcast %114 : vector<8x1xi32> to vector<8x64xi32>
    %116 = arith.cmpi eq, %94, %115 : vector<8x64xi32>
    %117 = arith.ori %104, %116 : vector<8x64xi1>
    %cst_39 = arith.constant dense<true> : vector<8x64xi1>
    %118 = arith.xori %116, %cst_39 : vector<8x64xi1>
    %119 = arith.andi %103, %118 : vector<8x64xi1>
    %cst_40 = arith.constant 0x7F800000 : f32
    %120 = vector.broadcast %cst_40 : f32 to vector<8x64xf32>
    %121 = arith.select %119, %92, %120 : vector<8x64xi1>, vector<8x64xf32>
    %cst_41 = arith.constant dense<0x7F800000> : vector<8xf32>
    %122 = vector.multi_reduction <minimumf>, %121, %cst_41 [1] : vector<8x64xf32> to vector<8xf32>
    %123 = vector.shape_cast %122 : vector<8xf32> to vector<8x1xf32>
    %124 = vector.broadcast %123 : vector<8x1xf32> to vector<8x64xf32>
    %125 = arith.cmpf oeq, %121, %124 : vector<8x64xf32>
    %c64_i32_42 = arith.constant 64 : i32
    %126 = vector.broadcast %c64_i32_42 : i32 to vector<8x64xi32>
    %127 = arith.select %125, %94, %126 : vector<8x64xi1>, vector<8x64xi32>
    %cst_43 = arith.constant dense<2147483647> : vector<8xi32>
    %128 = vector.multi_reduction <minsi>, %127, %cst_43 [1] : vector<8x64xi32> to vector<8xi32>
    %129 = vector.shape_cast %128 : vector<8xi32> to vector<8x1xi32>
    %130 = vector.broadcast %129 : vector<8x1xi32> to vector<8x64xi32>
    %131 = arith.cmpi eq, %94, %130 : vector<8x64xi32>
    %132 = arith.ori %117, %131 : vector<8x64xi1>
    %cst_44 = arith.constant dense<true> : vector<8x64xi1>
    %133 = arith.xori %131, %cst_44 : vector<8x64xi1>
    %134 = arith.andi %119, %133 : vector<8x64xi1>
    %cst_45 = arith.constant 0x7F800000 : f32
    %135 = vector.broadcast %cst_45 : f32 to vector<8x64xf32>
    %136 = arith.select %134, %92, %135 : vector<8x64xi1>, vector<8x64xf32>
    %cst_46 = arith.constant dense<0x7F800000> : vector<8xf32>
    %137 = vector.multi_reduction <minimumf>, %136, %cst_46 [1] : vector<8x64xf32> to vector<8xf32>
    %138 = vector.shape_cast %137 : vector<8xf32> to vector<8x1xf32>
    %139 = vector.broadcast %138 : vector<8x1xf32> to vector<8x64xf32>
    %140 = arith.cmpf oeq, %136, %139 : vector<8x64xf32>
    %c64_i32_47 = arith.constant 64 : i32
    %141 = vector.broadcast %c64_i32_47 : i32 to vector<8x64xi32>
    %142 = arith.select %140, %94, %141 : vector<8x64xi1>, vector<8x64xi32>
    %cst_48 = arith.constant dense<2147483647> : vector<8xi32>
    %143 = vector.multi_reduction <minsi>, %142, %cst_48 [1] : vector<8x64xi32> to vector<8xi32>
    %144 = vector.shape_cast %143 : vector<8xi32> to vector<8x1xi32>
    %145 = vector.broadcast %144 : vector<8x1xi32> to vector<8x64xi32>
    %146 = arith.cmpi eq, %94, %145 : vector<8x64xi32>
    %147 = arith.ori %132, %146 : vector<8x64xi1>
    %cst_49 = arith.constant 0.333333343 : f32
    %cst_50 = arith.constant 0.000000e+00 : f32
    %148 = vector.broadcast %cst_49 : f32 to vector<8x64xf32>
    %149 = vector.broadcast %cst_50 : f32 to vector<8x64xf32>
    %150 = arith.select %147, %148, %149 : vector<8x64xi1>, vector<8x64xf32>
    %cst_51 = arith.constant dense<0.000000e+00> : vector<8x32xf32>
    %151 = tpu.matmul %150, %3, %cst_51 {dimension_numbers = #tpu.dot_dimension_numbers<[1], [0], [0], [1], [0, 0, 1, 1], [], []>} : vector<8x64xf32>, vector<64x32xf32>, vector<8x32xf32> -> vector<8x32xf32>
    %152 = arith.mulf %0, %0 : vector<8x32xf32>
    %cst_52 = arith.constant dense<0.000000e+00> : vector<8xf32>
    %153 = vector.multi_reduction <add>, %152, %cst_52 [1] : vector<8x32xf32> to vector<8xf32>
    %154 = vector.shape_cast %153 : vector<8xf32> to vector<8x1xf32>
    %155 = math.sqrt %154 : vector<8x1xf32>
    %cst_53 = arith.constant 9.99999996E-13 : f32
    %156 = vector.broadcast %cst_53 : f32 to vector<8x1xf32>
    %157 = arith.maximumf %155, %156 : vector<8x1xf32>
    %cst_54 = arith.constant 1.000000e+00 : f32
    %158 = vector.broadcast %cst_54 : f32 to vector<8x1xf32>
    %159 = arith.divf %158, %157 : vector<8x1xf32>
    %160 = arith.mulf %1, %1 : vector<8x32xf32>
    %cst_55 = arith.constant dense<0.000000e+00> : vector<8xf32>
    %161 = vector.multi_reduction <add>, %160, %cst_55 [1] : vector<8x32xf32> to vector<8xf32>
    %162 = vector.shape_cast %161 : vector<8xf32> to vector<8x1xf32>
    %163 = math.sqrt %162 : vector<8x1xf32>
    %cst_56 = arith.constant 9.99999996E-13 : f32
    %164 = vector.broadcast %cst_56 : f32 to vector<8x1xf32>
    %165 = arith.maximumf %163, %164 : vector<8x1xf32>
    %cst_57 = arith.constant 1.000000e+00 : f32
    %166 = vector.broadcast %cst_57 : f32 to vector<8x1xf32>
    %167 = arith.divf %166, %165 : vector<8x1xf32>
    %168 = vector.broadcast %159 : vector<8x1xf32> to vector<8x32xf32>
    %169 = arith.mulf %0, %168 : vector<8x32xf32>
    %170 = vector.broadcast %167 : vector<8x1xf32> to vector<8x32xf32>
    %171 = arith.mulf %1, %170 : vector<8x32xf32>
    "tpu.trace_start"() <{level = 10 : i32, message = "md,nd->mn"}> : () -> ()
    %cst_58 = arith.constant dense<0.000000e+00> : vector<8x8xf32>
    %172 = tpu.matmul %169, %171, %cst_58 {dimension_numbers = #tpu.dot_dimension_numbers<[1], [1], [0], [0], [0, 0, 1, 0], [], []>} : vector<8x32xf32>, vector<8x32xf32>, vector<8x8xf32> -> vector<8x8xf32>
    "tpu.trace_stop"() : () -> ()
    %cst_59 = arith.constant 5.000000e+01 : f32
    %173 = vector.broadcast %cst_59 : f32 to vector<8x8xf32>
    %174 = arith.mulf %172, %173 : vector<8x8xf32>
    %175 = tpu.iota {dimensions = array<i32: 0>} : vector<8x8xi32>
    %176 = tpu.iota {dimensions = array<i32: 1>} : vector<8x8xi32>
    %177 = arith.cmpi eq, %175, %176 : vector<8x8xi32>
    %cst_60 = arith.constant 0.000000e+00 : f32
    %178 = vector.broadcast %cst_60 : f32 to vector<8x8xf32>
    %179 = arith.select %177, %174, %178 : vector<8x8xi1>, vector<8x8xf32>
    %cst_61 = arith.constant dense<0xFF800000> : vector<8xf32>
    %180 = vector.multi_reduction <maximumf>, %174, %cst_61 [1] : vector<8x8xf32> to vector<8xf32>
    %181 = vector.shape_cast %180 : vector<8xf32> to vector<8x1xf32>
    %182 = vector.broadcast %181 : vector<8x1xf32> to vector<8x8xf32>
    %183 = arith.subf %174, %182 : vector<8x8xf32>
    %184 = math.exp %183 : vector<8x8xf32>
    %cst_62 = arith.constant dense<0.000000e+00> : vector<8xf32>
    %185 = vector.multi_reduction <add>, %184, %cst_62 [1] : vector<8x8xf32> to vector<8xf32>
    %186 = vector.shape_cast %185 : vector<8xf32> to vector<8x1xf32>
    %187 = math.log %186 : vector<8x1xf32>
    %188 = arith.addf %187, %181 : vector<8x1xf32>
    %cst_63 = arith.constant dense<0.000000e+00> : vector<8xf32>
    %189 = vector.multi_reduction <add>, %179, %cst_63 [1] : vector<8x8xf32> to vector<8xf32>
    %190 = vector.shape_cast %189 : vector<8xf32> to vector<8x1xf32>
    %191 = arith.subf %188, %190 : vector<8x1xf32>
    %cst_64 = arith.constant dense<0.000000e+00> : vector<1xf32>
    %192 = vector.multi_reduction <add>, %191, %cst_64 [0] : vector<8x1xf32> to vector<1xf32>
    %193 = vector.shape_cast %192 : vector<1xf32> to vector<1x1xf32>
    %cst_65 = arith.constant dense<0xFF800000> : vector<8xf32>
    %194 = vector.multi_reduction <maximumf>, %174, %cst_65 [0] : vector<8x8xf32> to vector<8xf32>
    %195 = vector.shape_cast %194 : vector<8xf32> to vector<1x8xf32>
    %196 = vector.broadcast %195 : vector<1x8xf32> to vector<8x8xf32>
    %197 = arith.subf %174, %196 : vector<8x8xf32>
    %198 = math.exp %197 : vector<8x8xf32>
    %cst_66 = arith.constant dense<0.000000e+00> : vector<8xf32>
    %199 = vector.multi_reduction <add>, %198, %cst_66 [0] : vector<8x8xf32> to vector<8xf32>
    %200 = vector.shape_cast %199 : vector<8xf32> to vector<1x8xf32>
    %201 = math.log %200 : vector<1x8xf32>
    %202 = arith.addf %201, %195 : vector<1x8xf32>
    %cst_67 = arith.constant dense<0.000000e+00> : vector<8xf32>
    %203 = vector.multi_reduction <add>, %179, %cst_67 [0] : vector<8x8xf32> to vector<8xf32>
    %204 = vector.shape_cast %203 : vector<8xf32> to vector<1x8xf32>
    %205 = arith.subf %202, %204 : vector<1x8xf32>
    %cst_68 = arith.constant dense<0.000000e+00> : vector<1xf32>
    %206 = vector.multi_reduction <add>, %205, %cst_68 [1] : vector<1x8xf32> to vector<1xf32>
    %207 = vector.shape_cast %206 : vector<1xf32> to vector<1x1xf32>
    %208 = arith.addf %193, %207 : vector<1x1xf32>
    %cst_69 = arith.constant 6.250000e-02 : f32
    %209 = vector.broadcast %cst_69 : f32 to vector<1x1xf32>
    %210 = arith.mulf %208, %209 : vector<1x1xf32>
    %c0_70 = arith.constant 0 : index
    %c0_71 = arith.constant 0 : index
    %211 = vector.load %arg4[%c0_70, %c0_71] : memref<1x1xf32, #tpu.memory_space<vmem>>, vector<1x1xf32>
    tpu.vector_store %arg4[%c0_70, %c0_71], %210 {strides = array<i32>} : memref<1x1xf32, #tpu.memory_space<vmem>>, vector<1x1xf32>,
    %212 = arith.mulf %0, %0 : vector<8x32xf32>
    %cst_72 = arith.constant dense<0.000000e+00> : vector<8xf32>
    %213 = vector.multi_reduction <add>, %212, %cst_72 [1] : vector<8x32xf32> to vector<8xf32>
    %214 = vector.shape_cast %213 : vector<8xf32> to vector<8x1xf32>
    %215 = arith.mulf %77, %77 : vector<8x32xf32>
    %cst_73 = arith.constant dense<0.000000e+00> : vector<8xf32>
    %216 = vector.multi_reduction <add>, %215, %cst_73 [1] : vector<8x32xf32> to vector<8xf32>
    %217 = vector.shape_cast %216 : vector<8xf32> to vector<8x1xf32>
    %218 = arith.addf %214, %217 : vector<8x1xf32>
    %219 = math.sqrt %218 : vector<8x1xf32>
    %cst_74 = arith.constant 9.99999996E-13 : f32
    %220 = vector.broadcast %cst_74 : f32 to vector<8x1xf32>
    %221 = arith.maximumf %219, %220 : vector<8x1xf32>
    %cst_75 = arith.constant 1.000000e+00 : f32
    %222 = vector.broadcast %cst_75 : f32 to vector<8x1xf32>
    %223 = arith.divf %222, %221 : vector<8x1xf32>
    %224 = arith.mulf %1, %1 : vector<8x32xf32>
    %cst_76 = arith.constant dense<0.000000e+00> : vector<8xf32>
    %225 = vector.multi_reduction <add>, %224, %cst_76 [1] : vector<8x32xf32> to vector<8xf32>
    %226 = vector.shape_cast %225 : vector<8xf32> to vector<8x1xf32>
    %227 = arith.mulf %151, %151 : vector<8x32xf32>
    %cst_77 = arith.constant dense<0.000000e+00> : vector<8xf32>
    %228 = vector.multi_reduction <add>, %227, %cst_77 [1] : vector<8x32xf32> to vector<8xf32>
    %229 = vector.shape_cast %228 : vector<8xf32> to vector<8x1xf32>
    %230 = arith.addf %226, %229 : vector<8x1xf32>
    %231 = math.sqrt %230 : vector<8x1xf32>
    %cst_78 = arith.constant 9.99999996E-13 : f32
    %232 = vector.broadcast %cst_78 : f32 to vector<8x1xf32>
    %233 = arith.maximumf %231, %232 : vector<8x1xf32>
    %cst_79 = arith.constant 1.000000e+00 : f32
    %234 = vector.broadcast %cst_79 : f32 to vector<8x1xf32>
    %235 = arith.divf %234, %233 : vector<8x1xf32>
    %236 = vector.broadcast %223 : vector<8x1xf32> to vector<8x32xf32>
    %237 = arith.mulf %0, %236 : vector<8x32xf32>
    %238 = vector.broadcast %235 : vector<8x1xf32> to vector<8x32xf32>
    %239 = arith.mulf %1, %238 : vector<8x32xf32>
    "tpu.trace_start"() <{level = 10 : i32, message = "md,nd->mn"}> : () -> ()
    %cst_80 = arith.constant dense<0.000000e+00> : vector<8x8xf32>
    %240 = tpu.matmul %237, %239, %cst_80 {dimension_numbers = #tpu.dot_dimension_numbers<[1], [1], [0], [0], [0, 0, 1, 0], [], []>} : vector<8x32xf32>, vector<8x32xf32>, vector<8x8xf32> -> vector<8x8xf32>
    "tpu.trace_stop"() : () -> ()
    %241 = vector.broadcast %223 : vector<8x1xf32> to vector<8x32xf32>
    %242 = arith.mulf %77, %241 : vector<8x32xf32>
    %243 = vector.broadcast %235 : vector<8x1xf32> to vector<8x32xf32>
    %244 = arith.mulf %151, %243 : vector<8x32xf32>
    "tpu.trace_start"() <{level = 10 : i32, message = "md,nd->mn"}> : () -> ()
    %cst_81 = arith.constant dense<0.000000e+00> : vector<8x8xf32>
    %245 = tpu.matmul %242, %244, %cst_81 {dimension_numbers = #tpu.dot_dimension_numbers<[1], [1], [0], [0], [0, 0, 1, 0], [], []>} : vector<8x32xf32>, vector<8x32xf32>, vector<8x8xf32> -> vector<8x8xf32>
    "tpu.trace_stop"() : () -> ()
    %246 = arith.addf %240, %245 : vector<8x8xf32>
    %cst_82 = arith.constant 5.000000e+01 : f32
    %247 = vector.broadcast %cst_82 : f32 to vector<8x8xf32>
    %248 = arith.mulf %246, %247 : vector<8x8xf32>
    %249 = tpu.iota {dimensions = array<i32: 0>} : vector<8x8xi32>
    %250 = tpu.iota {dimensions = array<i32: 1>} : vector<8x8xi32>
    %251 = arith.cmpi eq, %249, %250 : vector<8x8xi32>
    %cst_83 = arith.constant 0.000000e+00 : f32
    %252 = vector.broadcast %cst_83 : f32 to vector<8x8xf32>
    %253 = arith.select %251, %248, %252 : vector<8x8xi1>, vector<8x8xf32>
    %cst_84 = arith.constant dense<0xFF800000> : vector<8xf32>
    %254 = vector.multi_reduction <maximumf>, %248, %cst_84 [1] : vector<8x8xf32> to vector<8xf32>
    %255 = vector.shape_cast %254 : vector<8xf32> to vector<8x1xf32>
    %256 = vector.broadcast %255 : vector<8x1xf32> to vector<8x8xf32>
    %257 = arith.subf %248, %256 : vector<8x8xf32>
    %258 = math.exp %257 : vector<8x8xf32>
    %cst_85 = arith.constant dense<0.000000e+00> : vector<8xf32>
    %259 = vector.multi_reduction <add>, %258, %cst_85 [1] : vector<8x8xf32> to vector<8xf32>
    %260 = vector.shape_cast %259 : vector<8xf32> to vector<8x1xf32>
    %261 = math.log %260 : vector<8x1xf32>
    %262 = arith.addf %261, %255 : vector<8x1xf32>
    %cst_86 = arith.constant dense<0.000000e+00> : vector<8xf32>
    %263 = vector.multi_reduction <add>, %253, %cst_86 [1] : vector<8x8xf32> to vector<8xf32>
    %264 = vector.shape_cast %263 : vector<8xf32> to vector<8x1xf32>
    %265 = arith.subf %262, %264 : vector<8x1xf32>
    %cst_87 = arith.constant dense<0.000000e+00> : vector<1xf32>
    %266 = vector.multi_reduction <add>, %265, %cst_87 [0] : vector<8x1xf32> to vector<1xf32>
    %267 = vector.shape_cast %266 : vector<1xf32> to vector<1x1xf32>
    %cst_88 = arith.constant dense<0xFF800000> : vector<8xf32>
    %268 = vector.multi_reduction <maximumf>, %248, %cst_88 [0] : vector<8x8xf32> to vector<8xf32>
    %269 = vector.shape_cast %268 : vector<8xf32> to vector<1x8xf32>
    %270 = vector.broadcast %269 : vector<1x8xf32> to vector<8x8xf32>
    %271 = arith.subf %248, %270 : vector<8x8xf32>
    %272 = math.exp %271 : vector<8x8xf32>
    %cst_89 = arith.constant dense<0.000000e+00> : vector<8xf32>
    %273 = vector.multi_reduction <add>, %272, %cst_89 [0] : vector<8x8xf32> to vector<8xf32>
    %274 = vector.shape_cast %273 : vector<8xf32> to vector<1x8xf32>
    %275 = math.log %274 : vector<1x8xf32>
    %276 = arith.addf %275, %269 : vector<1x8xf32>
    %cst_90 = arith.constant dense<0.000000e+00> : vector<8xf32>
    %277 = vector.multi_reduction <add>, %253, %cst_90 [0] : vector<8x8xf32> to vector<8xf32>
    %278 = vector.shape_cast %277 : vector<8xf32> to vector<1x8xf32>
    %279 = arith.subf %276, %278 : vector<1x8xf32>
    %cst_91 = arith.constant dense<0.000000e+00> : vector<1xf32>
    %280 = vector.multi_reduction <add>, %279, %cst_91 [1] : vector<1x8xf32> to vector<1xf32>
    %281 = vector.shape_cast %280 : vector<1xf32> to vector<1x1xf32>
    %282 = arith.addf %267, %281 : vector<1x1xf32>
    %cst_92 = arith.constant 6.250000e-02 : f32
    %283 = vector.broadcast %cst_92 : f32 to vector<1x1xf32>
    %284 = arith.mulf %282, %283 : vector<1x1xf32>
    %c0_93 = arith.constant 0 : index
    %c0_94 = arith.constant 0 : index
    %285 = vector.load %arg5[%c0_93, %c0_94] : memref<1x1xf32, #tpu.memory_space<vmem>>, vector<1x1xf32>
    tpu.vector_store %arg5[%c0_93, %c0_94], %284 {strides = array<i32>} : memref<1x1xf32, #tpu.memory_space<vmem>>, vector<1x1xf32>,
    return
  }
}

</mosaic_0001>

<bundles_post_ra>
// kernel: tpu_custom_call.1
= control target key start
LH: loop header
LB: loop body
LE: loop exit
PB: predicated region body
PF: predicated region fallthrough
CT: control target
= control target key end

     0   :  { %11 = vsyncpa [#allocation3], 0  ;;  %vm47_vm0 = vcmask 261120   ;;  %v1820_v2 = vmov 0.0|0.0   ;;  %vm1821_vm2 = vmmov 0   ;;  %v1822_v9 = vmov 0.0   ;;  %s2299_s0 = inlined_call_operand.vmem [shape: f32[8,32], index: 0, kind: input, shape index: {}]   ;;  %s2300_s1 = inlined_call_operand.vmem [shape: f32[8,32], index: 1, kind: input, shape index: {}]   ;;  %s2301_s2 = inlined_call_operand.vmem [shape: f32[128,32], index: 2, kind: input, shape index: {}]   ;;  %s2302_s3 = inlined_call_operand.vmem [shape: f32[64,32], index: 3, kind: input, shape index: {}]   ;;  %s2303_s4 = inlined_call_operand.hbm [shape: f32[1,1], index: 4, kind: output, shape index: {0}]   ;;  %s2304_s5 = inlined_call_operand.hbm [shape: f32[1,1], index: 5, kind: output, shape index: {1}]  }
   0x1   :  { %v23_v0 = vld [vmem:[%s2301_s2] sm:$0xff]  ;;  %v24_v1 = vld [vmem:[%s2301_s2 + $0x8] sm:$0xff]  ;;  %1622 = vmatprep.subr.bf16.mxu1 %v1820_v2  ;;  %1590 = vmatprep.subr.bf16.mxu0 %v1820_v2  ;;  %vm1868_vm1 = vmpackc.low %vm47_vm0, %vm47_vm0 }
   0x2   :  { %v169_v3 = vmul.f32 %v23_v0, %v23_v0  ;;  %v170_v4 = vmul.f32 %v24_v1, %v24_v1  ;;  %v25_v6 = vld [vmem:[%s2301_s2 + $0x10] sm:$0xff]  ;;  %v26_v7 = vld [vmem:[%s2301_s2 + $0x18] sm:$0xff]  ;;  %v1878_v8 = vpack.c.bf16 %v24_v1, %v23_v0  ;;  %1480 = vmatprep.mubr.msk.f32.mxu1 %vm1821_vm2, %v1822_v9  ;;  %1445 = vmatprep.mubr.msk.f32.mxu0 %vm1821_vm2, %v1822_v9 }
   0x3   :  { %v171_v11 = vmul.f32 %v25_v6, %v25_v6  ;;  %v172_v12 = vmul.f32 %v26_v7, %v26_v7 }
   0x4   :  { %v1623_v10 = vpack.c.bf16 %v170_v4, %v169_v3  ;;  %1593 = vmatpush3.bf16.xpose.msk.msra.mxu0 %vm1868_vm1, %v1878_v8 }
   0x5   :  { %1594 = vmatprep.subr.bf16.mxu0 %v1820_v2 }
   0x6   :  { %1625 = vmatpush3.bf16.xpose.msk.msra.mxu1 %vm1868_vm1, %v1623_v10 }
   0x7   :  { %1626 = vmatprep.subr.bf16.mxu1 %v1820_v2 }
   0x8   :  { %12 = vsyncpa [#allocation5], 0  ;;  %v1891_v13 = vpack.c.bf16 %v26_v7, %v25_v6  ;;  %v1896_v14 = vld [vmem:[%s2299_s0] sm:$0xff]  ;;  %v1627_v15 = vpack.c.bf16 %v172_v12, %v171_v11  ;;  %v28_v18 = vld [vmem:[%s2301_s2 + $0x28] sm:$0xff]  ;;  %v1823_v54 = vmov 1.0   ;;  %v324_v60 = vlaneseq }
   0x9   :  { %v306_v16 = vmul.f32 %v1896_v14, %v1896_v14  ;;  %v27_v17 = vld [vmem:[%s2301_s2 + $0x20] sm:$0xff]  ;;  %v174_v21 = vmul.f32 %v28_v18, %v28_v18  ;;  %v29_v24 = vld [vmem:[%s2301_s2 + $0x30] sm:$0xff]  ;;  %v30_v25 = vld [vmem:[%s2301_s2 + $0x38] sm:$0xff]  ;;  %vm1824_vm13 = vmmov 1  }
   0xa   :  { %v173_v20 = vmul.f32 %v27_v17, %v27_v17  ;;  %v1914_v22 = vpack.c.bf16 %v28_v18, %v27_v17  ;;  %v175_v26 = vmul.f32 %v29_v24, %v29_v24  ;;  %v176_v27 = vmul.f32 %v30_v25, %v30_v25  ;;  %v31_v30 = vld [vmem:[%s2301_s2 + $0x40] sm:$0xff]  ;;  %v32_v31 = vld [vmem:[%s2301_s2 + $0x48] sm:$0xff]  ;;  %v33_v36 = vld [vmem:[%s2301_s2 + $0x50] sm:$0xff] }
   0xb   :  { %v307_v19 = vsel %vm47_vm0, %v306_v16, 0.0  ;;  %v1603_v28 = vpack.c.bf16 %v30_v25, %v29_v24  ;;  %v177_v32 = vmul.f32 %v31_v30, %v31_v30  ;;  %v178_v33 = vmul.f32 %v32_v31, %v32_v31  ;;  %v34_v37 = vld [vmem:[%s2301_s2 + $0x58] sm:$0xff]  ;;  %v35_v42 = vld [vmem:[%s2301_s2 + $0x60] sm:$0xff]  ;;  %v36_v43 = vld [vmem:[%s2301_s2 + $0x68] sm:$0xff] }
   0xc   :  { %1597 = vmatpush3.bf16.xpose.msk.msra.mxu0 %vm1868_vm1, %v1891_v13  ;;  %308 = vadd.xlane.f32.xlu0 %v307_v19  ;;  %v1631_v23 = vpack.c.bf16 %v174_v21, %v173_v20  ;;  %v1635_v29 = vpack.c.bf16 %v176_v27, %v175_v26  ;;  %v1607_v34 = vpack.c.bf16 %v32_v31, %v31_v30  ;;  %v37_v48 = vld [vmem:[%s2301_s2 + $0x70] sm:$0xff]  ;;  %v38_v49 = vld [vmem:[%s2301_s2 + $0x78] sm:$0xff]  ;;  %v2005_v62 = vshrl.u32 %v324_v60, 7  ;;  %v44_v20 = vld [vmem:[%s2302_s3 + $0x28] sm:$0xff] }
   0xd   :  { %1598 = vmatprep.subr.bf16.mxu0 %v1820_v2  ;;  %v1639_v35 = vpack.c.bf16 %v178_v33, %v177_v32  ;;  %v179_v38 = vmul.f32 %v33_v36, %v33_v36  ;;  %v180_v39 = vmul.f32 %v34_v37, %v34_v37  ;;  %v1611_v40 = vpack.c.bf16 %v34_v37, %v33_v36 }
   0xe   :  { %1629 = vmatpush3.bf16.xpose.msk.msra.mxu1 %vm1868_vm1, %v1627_v15  ;;  %v181_v44 = vmul.f32 %v35_v42, %v35_v42  ;;  %v182_v45 = vmul.f32 %v36_v43, %v36_v43  ;;  %v1615_v46 = vpack.c.bf16 %v36_v43, %v35_v42  ;;  %v183_v50 = vmul.f32 %v37_v48, %v37_v48 }
   0xf   :  { %1630 = vmatprep.subr.bf16.mxu1 %v1820_v2  ;;  %v1643_v41 = vpack.c.bf16 %v180_v39, %v179_v38  ;;  %v184_v51 = vmul.f32 %v38_v49, %v38_v49  ;;  %v1619_v52 = vpack.c.bf16 %v38_v49, %v37_v48  ;;  %v326_v3 = vsub.s32 0, %v2005_v62 }
  0x10   :  { %v1647_v47 = vpack.c.bf16 %v182_v45, %v181_v44  ;;  %v2019_v16 = vadd.s32 1, %v2005_v62  ;;  %v2021_v17 = vand.u32 127, %v324_v60  ;;  %v336_v18 = vmul.u32 16, %v2005_v62 }
  0x11   :  { %v1651_v53 = vpack.c.bf16 %v184_v51, %v183_v50 }
  0x12   :  { %v339_v19 = vmul.u32 16, %v2019_v16  ;;  %vm2026_vm7 = vcmp.ge.s32.totalorder %v2021_v17, %v336_v18 }
  0x14   :  { %1601 = vmatpush3.bf16.xpose.msk.msra.mxu0 %vm1868_vm1, %v1914_v22  ;;  %vm2031_vm8 = vcmp.lt.s32.totalorder %v2021_v17, %v339_v19  ;;  %v43_v19 = vld [vmem:[%s2302_s3 + $0x20] sm:$0xff] }
  0x15   :  { %1602 = vmatprep.subr.bf16.mxu0 %v1820_v2  ;;  %vm341_vm9 = vmand %vm2026_vm7, %vm2031_vm8  ;;  %v580_v21 = vmul.f32 %v43_v19, %v43_v19 }
  0x16   :  { %1633 = vmatpush3.bf16.xpose.msk.msra.mxu1 %vm1868_vm1, %v1631_v23 }
  0x17   :  { %1634 = vmatprep.subr.bf16.mxu1 %v1820_v2 }
  0x1c   :  { %1605 = vmatpush3.bf16.xpose.msk.msra.mxu0 %vm1868_vm1, %v1603_v28 }
  0x1d   :  { %1606 = vmatprep.subr.bf16.mxu0 %v1820_v2 }
  0x1e   :  { %1637 = vmatpush3.bf16.xpose.msk.msra.mxu1 %vm1868_vm1, %v1635_v29 }
  0x1f   :  { %1638 = vmatprep.subr.bf16.mxu1 %v1820_v2 }
  0x24   :  { %1609 = vmatpush3.bf16.xpose.msk.msra.mxu0 %vm1868_vm1, %v1607_v34 }
  0x25   :  { %1610 = vmatprep.subr.bf16.mxu0 %v1820_v2 }
  0x26   :  { %1641 = vmatpush3.bf16.xpose.msk.msra.mxu1 %vm1868_vm1, %v1639_v35 }
  0x27   :  { %1642 = vmatprep.subr.bf16.mxu1 %v1820_v2 }
  0x2c   :  { %1613 = vmatpush3.bf16.xpose.msk.msra.mxu0 %vm1868_vm1, %v1611_v40 }
  0x2d   :  { %1614 = vmatprep.subr.bf16.mxu0 %v1820_v2 }
  0x2e   :  { %1645 = vmatpush3.bf16.xpose.msk.msra.mxu1 %vm1868_vm1, %v1643_v41 }
  0x2f   :  { %1646 = vmatprep.subr.bf16.mxu1 %v1820_v2 }
  0x34   :  { %1617 = vmatpush3.bf16.xpose.msk.msra.mxu0 %vm1868_vm1, %v1615_v46 }
  0x35   :  { %1618 = vmatprep.subr.bf16.mxu0 %v1820_v2 }
  0x36   :  { %1649 = vmatpush3.bf16.xpose.msk.msra.mxu1 %vm1868_vm1, %v1647_v47 }
  0x37   :  { %1650 = vmatprep.subr.bf16.mxu1 %v1820_v2 }
  0x3c   :  { %1621 = vmatpush3.bf16.xpose.msk.msra.mxu0 %vm1868_vm1, %v1619_v52 }
  0x3d   :  { %1654 = vmatprep.subr.bf16.mxu0 %v1820_v2 }
  0x3e   :  { %1653 = vmatpush3.bf16.xpose.msk.msra.mxu1 %vm1868_vm1, %v1651_v53 }
  0x3f   :  { %1678 = vmatprep.subr.bf16.mxu1 %v1820_v2 }
  0x43   :  { %1446 = vmatmul.mubr.msk.f32.vlgmr.msra.gmra.mrb[0].mxu0 %vm47_vm0, %v1896_v14 }
  0x44   :  { %1656 = vmatpush3.bf16.msra.mxu0 %v1878_v8  ;;  %1515 = vmatprep.mubr.msk.f32.mxu0 %vm1821_vm2, %v1822_v9 }
  0x45   :  { %1481 = vmatmul.mubr.msk.f32.vlgmr.msra.gmra.mrb[0].mxu1 %vm47_vm0, %v1823_v54  ;;  %1657 = vmatprep.subr.bf16.mxu0 %v1820_v2 }
  0x46   :  { %1534 = vmatprep.mubr.msk.f32.mxu1 %vm1821_vm2, %v1822_v9 }
  0x48   :  { %1659 = vmatpush3.bf16.msra.mxu0 %v1891_v13 }
  0x49   :  { %1660 = vmatprep.subr.bf16.mxu0 %v1820_v2 }
  0x4c   :  { %1662 = vmatpush3.bf16.msra.mxu0 %v1914_v22 }
  0x4d   :  { %1663 = vmatprep.subr.bf16.mxu0 %v1820_v2 }
  0x50   :  { %1665 = vmatpush3.bf16.msra.mxu0 %v1603_v28 }
  0x51   :  { %1666 = vmatprep.subr.bf16.mxu0 %v1820_v2 }
  0x54   :  { %1668 = vmatpush3.bf16.msra.mxu0 %v1607_v34 }
  0x55   :  { %1669 = vmatprep.subr.bf16.mxu0 %v1820_v2 }
  0x58   :  { %1671 = vmatpush3.bf16.msra.mxu0 %v1611_v40 }
  0x59   :  { %1672 = vmatprep.subr.bf16.mxu0 %v1820_v2 }
  0x5c   :  { %1674 = vmatpush3.bf16.msra.mxu0 %v1615_v46 }
  0x5d   :  { %1675 = vmatprep.subr.bf16.mxu0 %v1820_v2 }
  0x60   :  { %1677 = vmatpush3.bf16.msra.mxu0 %v1619_v52 }
  0x61   :  { %1694 = vmatprep.subr.bf16.mxu0 %v1820_v2 }
  0x99   :  { %v2002_v55 = vpop.xlane.xlu0 %308 }
  0x9a   :  { %1732 = vrsqrt.f32 %v2002_v55  ;;  %vm312_vm3 = vcmp.eq.f32.partialorder %v2002_v55, inf  ;;  %v315_v4 = vand.u32 2147483648, %v2002_v55  ;;  %vm314_vm5 = vcmp.eq.f32.partialorder %v2002_v55, 0.0 }
  0xa4   :  { %v1733_v61 = vpop.eup %1732 }
  0xa5   :  { %v311_v63 = vmul.f32 %v1733_v61, %v2002_v55 }
  0xa7   :  { %v313_v7 = vsel %vm312_vm3, %v2002_v55, %v311_v63 }
  0xa8   :  { %v2015_v12 = vsel %vm314_vm5, %v315_v4, %v313_v7  ;;  %v40_v4 = vld [vmem:[%s2302_s3 + $0x8] sm:$0xff] }
  0xa9   :  { %v577_v7 = vmul.f32 %v40_v4, %v40_v4 }
 0x116   :  { %v165_v56 = vpop.f32.mrb[0].mxu0 }
 0x117   :  { %v1447_v58 = vpop.f32.mrb[1].mxu0 }
 0x118   :  { %v302_v57 = vpop.f32.mrb[0].mxu1 }
 0x119   :  { %1734 = vrsqrt.f32 %v302_v57  ;;  %v1482_v59 = vpop.f32.mrb[1].mxu1  ;;  %vm319_vm4 = vcmp.eq.f32.partialorder %v302_v57, inf  ;;  %v322_v6 = vand.u32 2147483648, %v302_v57  ;;  %vm321_vm6 = vcmp.eq.f32.partialorder %v302_v57, 0.0 }
 0x123   :  { %v1735_v0 = vpop.eup %1734 }
 0x124   :  { %v318_v1 = vmul.f32 %v1735_v0, %v302_v57 }
 0x126   :  { %v320_v8 = vsel %vm319_vm4, %v302_v57, %v318_v1  ;;  %v39_v1 = vld [vmem:[%s2302_s3] sm:$0xff] }
 0x127   :  { %v323_v10 = vsel %vm321_vm6, %v322_v6, %v320_v8  ;;  %v576_v6 = vmul.f32 %v39_v1, %v39_v1 }
 0x128   :  { %v327_v11 = vrot.slane %v323_v10, %v326_v3  ;;  %v41_v10 = vld [vmem:[%s2302_s3 + $0x10] sm:$0xff] }
 0x129   :  { %v1695_v8 = vpack.c.bf16 %v577_v7, %v576_v6 }
 0x12a   :  { %v328_v13 = vmul.f32 %v327_v11, %v2015_v12  ;;  %v42_v11 = vld [vmem:[%s2302_s3 + $0x18] sm:$0xff] }
 0x12c   :  { %v329_v15 = vmax.f32 %v328_v13, 1e-08  ;;  %v578_v13 = vmul.f32 %v41_v10, %v41_v10 }
 0x12e   :  { %1736 = vrcp.f32 %v329_v15  ;;  %v579_v15 = vmul.f32 %v42_v11, %v42_v11 }
 0x130   :  { %v1699_v18 = vpack.c.bf16 %v579_v15, %v578_v13 }
 0x138   :  { %v1737_v22 = vpop.eup %1736 }
 0x139   :  { %v331_v23 = vmul.f32 %v1737_v22, %v165_v56  ;;  %v581_v22 = vmul.f32 %v44_v20, %v44_v20 }
 0x13b   :  { %v342_v24 = vsel %vm341_vm9, %v331_v23, inf }
 0x13c   :  { %343 = vmin.xlane.f32.xlu0 %v342_v24 }
 0x1c9   :  { %v344_v25 = vpop.xlane.xlu0 %343 }
 0x1ca   :  { %vm345_vm10 = vcmp.eq.f32.partialorder %v342_v24, %v344_v25  ;;  %v45_v24 = vld [vmem:[%s2302_s3 + $0x30] sm:$0xff]  ;;  %v46_v25 = vld [vmem:[%s2302_s3 + $0x38] sm:$0xff] }
 0x1cb   :  { %v346_v26 = vsel %vm345_vm10, %v2021_v17, 128 }
 0x1cc   :  { %v348_v27 = vshra.s32 %v346_v26, 16  ;;  %v347_v29 = vand.u32 65535, %v346_v26  ;;  %v582_v26 = vmul.f32 %v45_v24, %v45_v24 }
 0x1ce   :  { %v350_v28 = vcvt.s32.f32 %v348_v27  ;;  %v349_v31 = vcvt.s32.f32 %v347_v29  ;;  %v583_v27 = vmul.f32 %v46_v25, %v46_v25  ;;  %v1679_v29 = vpack.c.bf16 %v40_v4, %v39_v1 }
 0x1d0   :  { %351 = vmin.xlane.f32.xlu1 %v350_v28  ;;  %1681 = vmatpush3.bf16.xpose.msk.msra.mxu1 %vm1868_vm1, %v1679_v29 }
 0x1d1   :  { %1682 = vmatprep.subr.bf16.mxu1 %v1820_v2 }
 0x25d   :  { %v352_v30 = vpop.xlane.xlu1 %351 }
 0x25e   :  { %vm353_vm11 = vcmp.eq.f32.partialorder %v350_v28, %v352_v30  ;;  %v358_v33 = vcvt.f32.s32 %v352_v30  ;;  %v1707_v28 = vpack.c.bf16 %v583_v27, %v582_v26  ;;  %v1683_v30 = vpack.c.bf16 %v42_v11, %v41_v10 }
 0x25f   :  { %v354_v32 = vsel %vm353_vm11, %v349_v31, inf  ;;  %v2106_v31 = vld [vmem:[%s2300_s1] sm:$0xff]  ;;  %s1826_s1 = smov [#allocation2]  }
 0x260   :  { %355 = vmin.xlane.f32.xlu1 %v354_v32  ;;  %v359_v35 = vshll.u32 %v358_v33, 16  ;;  %v678_v32 = vmul.f32 %v2106_v31, %v2106_v31  ;;  %1685 = vmatpush3.bf16.xpose.msk.msra.mxu1 %vm1868_vm1, %v1683_v30  ;;  %s1247_s3 = sshll.u32 %s1826_s1, 4  ;;  %s1248_s3 = int_to_ptr.vmem [resolvable:$true] %s1247_s3 }
 0x261   :  { %1686 = vmatprep.subr.bf16.mxu1 %v1820_v2  ;;  %s1772_s17 = scalar_lea.vmem %s1248_s3, 16  ;;  %s1776_s18 = scalar_lea.vmem %s1248_s3, 32 }
 0x262   :  { %v679_v33 = vsel %vm47_vm0, %v678_v32, 0.0  ;;  %p1773_p0 = scmp.ne.s32.totalorder %s1248_s3, %s1772_s17  ;;  %p1777_p1 = scmp.lt.s32.totalorder %s1248_s3, %s1248_s3 }
 0x263   :  { %p1778_p2 = scmp.lt.s32.totalorder %s1776_s18, %s1772_s17 }
 0x265   :  { %p1779_p3 = por %p1778_p2, %p1777_p1 }
 0x267   :  { %p1780_p4 = pnand %p1779_p3, %p1773_p0 }
 0x2ed   :  { %v356_v34 = vpop.xlane.xlu1 %355 }
 0x2ee   :  { %v357_v36 = vcvt.f32.s32 %v356_v34  ;;  %v1687_v34 = vpack.c.bf16 %v44_v20, %v43_v19 }
 0x2f0   :  { %v2045_v37 = vadd.s32 %v359_v35, %v357_v36  ;;  %1689 = vmatpush3.bf16.xpose.msk.msra.mxu1 %vm1868_vm1, %v1687_v34  ;;  %v1691_v35 = vpack.c.bf16 %v46_v25, %v45_v24 }
 0x2f1   :  { %1690 = vmatprep.subr.bf16.mxu1 %v1820_v2 }
 0x2f2   :  { %vm361_vm12 = vcmp.eq.s32.totalorder %v2021_v17, %v2045_v37 }
 0x2f3   :  { %vm362_vm14 = vmxor %vm361_vm12, %vm1824_vm13 }
 0x2f4   :  { %vm2058_vm15 = vmand %vm341_vm9, %vm362_vm14 }
 0x2f5   :  { %v364_v39 = vsel %vm2058_vm15, %v331_v23, inf }
 0x2f6   :  { %365 = vmin.xlane.f32.xlu0 %v364_v39 }
 0x2f8   :  { %1693 = vmatpush3.bf16.xpose.msk.msra.mxu1 %vm1868_vm1, %v1691_v35 }
 0x2f9   :  { %1710 = vmatprep.subr.bf16.mxu1 %v1820_v2 }
 0x2ff   :  { %1535 = vmatmul.mubr.msk.f32.vlgmr.msra.gmra.mrb[2].mxu1 %vm47_vm0, %v2106_v31 }
 0x300   :  { %1712 = vmatpush3.bf16.msra.mxu1 %v1679_v29  ;;  %1572 = vmatprep.mubr.msk.f32.mxu1 %vm1821_vm2, %v1822_v9 }
 0x301   :  { %1713 = vmatprep.subr.bf16.mxu1 %v1820_v2 }
 0x304   :  { %1715 = vmatpush3.bf16.msra.mxu1 %v1683_v30 }
 0x305   :  { %1716 = vmatprep.subr.bf16.mxu1 %v1820_v2 }
 0x308   :  { %1718 = vmatpush3.bf16.msra.mxu1 %v1687_v34 }
 0x309   :  { %1719 = vmatprep.subr.bf16.mxu1 %v1820_v2 }
 0x30c   :  { %1721 = vmatpush3.bf16.msra.mxu1 %v1691_v35 }
 0x30d   :  { %1575 = vmatprep.subr.mxu1 %v1822_v9 }
 0x383   :  { %v366_v40 = vpop.xlane.xlu0 %365 }
 0x384   :  { %vm367_vm3 = vcmp.eq.f32.partialorder %v364_v39, %v366_v40 }
 0x385   :  { %v368_v41 = vsel %vm367_vm3, %v2021_v17, 128 }
 0x386   :  { %v370_v42 = vshra.s32 %v368_v41, 16  ;;  %v369_v44 = vand.u32 65535, %v368_v41 }
 0x388   :  { %v372_v43 = vcvt.s32.f32 %v370_v42  ;;  %v371_v46 = vcvt.s32.f32 %v369_v44  ;;  %v1825_v42 = vmov 0.33333334  }
 0x38a   :  { %373 = vmin.xlane.f32.xlu1 %v372_v43 }
 0x3d2   :  { %v572_v37 = vpop.f32.mrb[2].mxu1 }
 0x417   :  { %v374_v45 = vpop.xlane.xlu1 %373 }
 0x418   :  { %vm375_vm4 = vcmp.eq.f32.partialorder %v372_v43, %v374_v45  ;;  %v380_v48 = vcvt.f32.s32 %v374_v45  ;;  %v1536_v43 = vpop.f32.mrb[3].mxu1 }
 0x419   :  { %v376_v47 = vsel %vm375_vm4, %v371_v46, inf }
 0x41a   :  { %377 = vmin.xlane.f32.xlu0 %v376_v47  ;;  %v381_v50 = vshll.u32 %v380_v48, 16 }
 0x4a7   :  { %v378_v49 = vpop.xlane.xlu0 %377 }
 0x4a8   :  { %v379_v51 = vcvt.f32.s32 %v378_v49 }
 0x4aa   :  { %v2065_v52 = vadd.s32 %v381_v50, %v379_v51 }
 0x4ac   :  { %vm383_vm5 = vcmp.eq.s32.totalorder %v2021_v17, %v2065_v52 }
 0x4ad   :  { %vm385_vm6 = vmxor %vm383_vm5, %vm1824_vm13 }
 0x4ae   :  { %vm386_vm7 = vmand %vm2058_vm15, %vm385_vm6 }
 0x4af   :  { %v387_v53 = vsel %vm386_vm7, %v331_v23, inf  ;;  %v1703_v23 = vpack.c.bf16 %v581_v22, %v580_v21  ;;  %vm384_vm10 = vmor %vm361_vm12, %vm383_vm5  ;;  %vm710_vm7 = vcmask 523264  }
 0x4b0   :  { %388 = vmin.xlane.f32.xlu1 %v387_v53 }
 0x53d   :  { %v389_v56 = vpop.xlane.xlu1 %388 }
 0x53e   :  { %vm390_vm8 = vcmp.eq.f32.partialorder %v387_v53, %v389_v56 }
 0x53f   :  { %v391_v57 = vsel %vm390_vm8, %v2021_v17, 128 }
 0x540   :  { %v393_v58 = vshra.s32 %v391_v57, 16  ;;  %v392_v60 = vand.u32 65535, %v391_v57 }
 0x542   :  { %v395_v59 = vcvt.s32.f32 %v393_v58  ;;  %v394_v63 = vcvt.s32.f32 %v392_v60 }
 0x544   :  { %396 = vmin.xlane.f32.xlu0 %v395_v59 }
 0x548   :  { %680 = vadd.xlane.f32.xlu0 %v679_v33 }
 0x5d1   :  { %v397_v61 = vpop.xlane.xlu0 %396 }
 0x5d2   :  { %vm398_vm9 = vcmp.eq.f32.partialorder %v395_v59, %v397_v61  ;;  %v403_v36 = vcvt.f32.s32 %v397_v61  ;;  %v704_v61 = vmul.u32 8, %v2005_v62 }
 0x5d3   :  { %v399_v0 = vsel %vm398_vm9, %v394_v63, inf  ;;  %v706_v63 = vmul.u32 8, %v2019_v16 }
 0x5d4   :  { %400 = vmin.xlane.f32.xlu1 %v399_v0  ;;  %v404_v39 = vshll.u32 %v403_v36, 16  ;;  %vm2168_vm4 = vcmp.ge.s32.totalorder %v2021_v17, %v704_v61 }
 0x5d5   :  { %v2152_v46 = vpop.xlane.xlu0 %680  ;;  %vm2173_vm5 = vcmp.lt.s32.totalorder %v2021_v17, %v706_v63 }
 0x5d6   :  { %1738 = vrsqrt.f32 %v2152_v46  ;;  %vm686_vm15 = vcmp.eq.f32.partialorder %v2152_v46, 0.0  ;;  %vm708_vm6 = vmand %vm2168_vm4, %vm2173_vm5 }
 0x5e0   :  { %v1739_v49 = vpop.eup %1738 }
 0x661   :  { %v401_v38 = vpop.xlane.xlu1 %400 }
 0x662   :  { %v402_v40 = vcvt.f32.s32 %v401_v38 }
 0x664   :  { %v405_v41 = vadd.s32 %v404_v39, %v402_v40 }
 0x666   :  { %vm406_vm11 = vcmp.eq.s32.totalorder %v2021_v17, %v405_v41 }
 0x667   :  { %vm407_vm14 = vmor %vm384_vm10, %vm406_vm11 }
 0x668   :  { %1516 = vmatmul.mubr.msk.f32.vlgmr.msra.gmra.mrb[2].mxu0 %vm407_vm14, %v1825_v42 }
 0x669   :  { %1697 = vmatpush3.bf16.xpose.msk.msra.mxu0 %vm1868_vm1, %v1695_v8  ;;  %1553 = vmatprep.mubr.msk.f32.mxu0 %vm1821_vm2, %v1822_v9 }
 0x66a   :  { %1698 = vmatprep.subr.bf16.mxu0 %v1820_v2 }
 0x671   :  { %1701 = vmatpush3.bf16.xpose.msk.msra.mxu0 %vm1868_vm1, %v1699_v18 }
 0x672   :  { %1702 = vmatprep.subr.bf16.mxu0 %v1820_v2 }
 0x679   :  { %1705 = vmatpush3.bf16.xpose.msk.msra.mxu0 %vm1868_vm1, %v1703_v23 }
 0x67a   :  { %1706 = vmatprep.subr.bf16.mxu0 %v1820_v2  ;;  %v683_v2 = vmul.f32 %v1739_v49, %v2152_v46 }
 0x681   :  { %1709 = vmatpush3.bf16.xpose.msk.msra.mxu0 %vm1868_vm1, %v1707_v28  ;;  %vm684_vm1 = vcmp.eq.f32.partialorder %v2152_v46, inf }
 0x682   :  { %v685_v52 = vsel %vm684_vm1, %v2152_v46, %v683_v2 }
 0x688   :  { %1554 = vmatmul.mubr.msk.f32.vlgmr.msra.gmra.mrb[4].mxu0 %vm47_vm0, %v1823_v54  ;;  %v687_v54 = vand.u32 2147483648, %v2152_v46 }
 0x68a   :  { %v2162_v58 = vsel %vm686_vm15, %v687_v54, %v685_v52 }
 0x73b   :  { %v2150_v44 = vpop.f32.mrb[2].mxu0 }
 0x73c   :  { %v1517_v45 = vpop.f32.mrb[3].mxu0 }
 0x75b   :  { %v674_v47 = vpop.f32.mrb[4].mxu0 }
 0x75c   :  { %1740 = vrsqrt.f32 %v674_v47  ;;  %v1555_v48 = vpop.f32.mrb[5].mxu0  ;;  %vm691_vm12 = vcmp.eq.f32.partialorder %v674_v47, inf  ;;  %v694_v51 = vand.u32 2147483648, %v674_v47  ;;  %vm693_vm3 = vcmp.eq.f32.partialorder %v674_v47, 0.0 }
 0x766   :  { %v1741_v5 = vpop.eup %1740 }
 0x767   :  { %v690_v50 = vmul.f32 %v1741_v5, %v674_v47 }
 0x769   :  { %v692_v53 = vsel %vm691_vm12, %v674_v47, %v690_v50 }
 0x76a   :  { %v695_v56 = vsel %vm693_vm3, %v694_v51, %v692_v53  ;;  %v999_v53 = vmul.f32 %v2150_v44, %v2150_v44 }
 0x76b   :  { %v699_v57 = vrot.slane %v695_v56, %v326_v3 }
 0x76d   :  { %v700_v59 = vmul.f32 %v699_v57, %v2162_v58  ;;  %v1000_v57 = vsel %vm47_vm0, %v999_v53, 0.0 }
 0x76f   :  { %v701_v60 = vmax.f32 %v700_v59, 1e-08  ;;  %v859_v59 = vmax.f32 %v2162_v58, 1e-12 }
 0x771   :  { %1742 = vrcp.f32 %v701_v60  ;;  %v856_v60 = vmax.f32 %v2015_v12, 1e-12 }
 0x772   :  { %1744 = vrcp.f32 %v859_v59 }
 0x773   :  { %1746 = vrcp.f32 %v856_v60 }
 0x77b   :  { %v1743_v3 = vpop.eup %1742 }
 0x77c   :  { %v703_v4 = vmul.f32 %v1743_v3, %v572_v37 }
 0x77e   :  { %v709_v16 = vsel %vm708_vm6, %v703_v4, inf }
 0x77f   :  { %v711_v6 = vsel %vm710_vm7, %v709_v16, inf }
 0x780   :  { %712 = vmin.xlane.f32.xlu1 %v711_v6 }
 0x80d   :  { %v713_v7 = vpop.xlane.xlu1 %712 }
 0x80e   :  { %vm714_vm8 = vcmp.eq.f32.partialorder %v709_v16, %v713_v7 }
 0x80f   :  { %v715_v8 = vsel %vm714_vm8, %v2021_v17, 64 }
 0x810   :  { %v716_v10 = vsel %vm710_vm7, %v715_v8, 2147483647 }
 0x811   :  { %v718_v11 = vshra.s32 %v716_v10, 16  ;;  %v717_v15 = vand.u32 65535, %v716_v10 }
 0x813   :  { %v720_v13 = vcvt.s32.f32 %v718_v11  ;;  %v719_v19 = vcvt.s32.f32 %v717_v15 }
 0x815   :  { %721 = vmin.xlane.f32.xlu0 %v720_v13 }
 0x8a2   :  { %v722_v18 = vpop.xlane.xlu0 %721 }
 0x8a3   :  { %vm723_vm9 = vcmp.eq.f32.partialorder %v720_v13, %v722_v18  ;;  %v728_v21 = vcvt.f32.s32 %v722_v18 }
 0x8a4   :  { %v724_v20 = vsel %vm723_vm9, %v719_v19, inf }
 0x8a5   :  { %725 = vmin.xlane.f32.xlu1 %v724_v20  ;;  %v729_v23 = vshll.u32 %v728_v21, 16 }
 0x932   :  { %v726_v22 = vpop.xlane.xlu1 %725 }
 0x933   :  { %v727_v24 = vcvt.f32.s32 %v726_v22 }
 0x935   :  { %v730_v25 = vadd.s32 %v729_v23, %v727_v24 }
 0x937   :  { %vm731_vm10 = vcmp.eq.s32.totalorder %v2021_v17, %v730_v25 }
 0x938   :  { %vm732_vm11 = vmxor %vm731_vm10, %vm1824_vm13 }
 0x939   :  { %vm2198_vm14 = vmand %vm708_vm6, %vm732_vm11 }
 0x93a   :  { %v734_v27 = vsel %vm2198_vm14, %v703_v4, inf }
 0x93b   :  { %v735_v28 = vsel %vm710_vm7, %v734_v27, inf }
 0x93c   :  { %736 = vmin.xlane.f32.xlu0 %v735_v28 }
 0x9c9   :  { %v737_v29 = vpop.xlane.xlu0 %736 }
 0x9ca   :  { %vm738_vm1 = vcmp.eq.f32.partialorder %v734_v27, %v737_v29 }
 0x9cb   :  { %v739_v30 = vsel %vm738_vm1, %v2021_v17, 64 }
 0x9cc   :  { %v740_v32 = vsel %vm710_vm7, %v739_v30, 2147483647 }
 0x9cd   :  { %v742_v33 = vshra.s32 %v740_v32, 16  ;;  %v741_v35 = vand.u32 65535, %v740_v32 }
 0x9cf   :  { %v744_v34 = vcvt.s32.f32 %v742_v33  ;;  %v743_v38 = vcvt.s32.f32 %v741_v35 }
 0x9d1   :  { %745 = vmin.xlane.f32.xlu1 %v744_v34 }
 0xa5e   :  { %v746_v36 = vpop.xlane.xlu1 %745 }
 0xa5f   :  { %vm747_vm12 = vcmp.eq.f32.partialorder %v744_v34, %v746_v36  ;;  %v752_v40 = vcvt.f32.s32 %v746_v36 }
 0xa60   :  { %v748_v39 = vsel %vm747_vm12, %v743_v38, inf }
 0xa61   :  { %749 = vmin.xlane.f32.xlu0 %v748_v39  ;;  %v753_v42 = vshll.u32 %v752_v40, 16 }
 0xaee   :  { %v750_v41 = vpop.xlane.xlu0 %749 }
 0xaef   :  { %v751_v37 = vcvt.f32.s32 %v750_v41 }
 0xaf1   :  { %v754_v43 = vadd.s32 %v753_v42, %v751_v37 }
 0xaf3   :  { %vm755_vm15 = vcmp.eq.s32.totalorder %v2021_v17, %v754_v43 }
 0xaf4   :  { %vm757_vm3 = vmxor %vm755_vm15, %vm1824_vm13 }
 0xaf5   :  { %vm758_vm4 = vmand %vm2198_vm14, %vm757_vm3 }
 0xaf6   :  { %v759_v45 = vsel %vm758_vm4, %v703_v4, inf  ;;  %v1745_v4 = vpop.eup %1744  ;;  %vm756_vm6 = vmor %vm731_vm10, %vm755_vm15  ;;  %vm941_vm10 = vcmp.eq.s32.totalorder %v2005_v62, %v2021_v17 }
 0xaf7   :  { %v760_v47 = vsel %vm710_vm7, %v759_v45, inf  ;;  %v1747_v16 = vpop.eup %1746  ;;  %v863_v12 = vmul.f32 %v1745_v4, %v2106_v31 }
 0xaf8   :  { %761 = vmin.xlane.f32.xlu1 %v760_v47  ;;  %v862_v6 = vmul.f32 %v1747_v16, %v1896_v14 }
 0xb85   :  { %v762_v48 = vpop.xlane.xlu1 %761 }
 0xb86   :  { %vm763_vm5 = vcmp.eq.f32.partialorder %v759_v45, %v762_v48 }
 0xb87   :  { %v764_v49 = vsel %vm763_vm5, %v2021_v17, 64 }
 0xb88   :  { %v765_v2 = vsel %vm710_vm7, %v764_v49, 2147483647 }
 0xb89   :  { %v767_v5 = vshra.s32 %v765_v2, 16  ;;  %v766_v54 = vand.u32 65535, %v765_v2 }
 0xb8b   :  { %v769_v50 = vcvt.s32.f32 %v767_v5  ;;  %v768_v52 = vcvt.s32.f32 %v766_v54 }
 0xb8d   :  { %770 = vmin.xlane.f32.xlu0 %v769_v50 }
 0xc1a   :  { %v771_v51 = vpop.xlane.xlu0 %770 }
 0xc1b   :  { %vm772_vm13 = vcmp.eq.f32.partialorder %v769_v50, %v771_v51  ;;  %v777_v61 = vcvt.f32.s32 %v771_v51 }
 0xc1c   :  { %v773_v56 = vsel %vm772_vm13, %v768_v52, inf }
 0xc1d   :  { %774 = vmin.xlane.f32.xlu1 %v773_v56  ;;  %v778_v0 = vshll.u32 %v777_v61, 16 }
 0xc21   :  { %1001 = vadd.xlane.f32.xlu1 %v1000_v57 }
 0xcaa   :  { %v775_v63 = vpop.xlane.xlu1 %774 }
 0xcab   :  { %v776_v1 = vcvt.f32.s32 %v775_v63 }
 0xcad   :  { %v779_v3 = vadd.s32 %v778_v0, %v776_v1 }
 0xcae   :  { %v1002_v34 = vpop.xlane.xlu1 %1001 }
 0xcaf   :  { %vm780_vm8 = vcmp.eq.s32.totalorder %v2021_v17, %v779_v3  ;;  %v1003_v35 = vadd.f32 %v1002_v34, %v2002_v55 }
 0xcb0   :  { %vm781_vm9 = vmor %vm756_vm6, %vm780_vm8 }
 0xcb1   :  { %v782_v58 = vsel %vm781_vm9, 0.33333334, %v1822_v9  ;;  %vm1006_vm11 = vcmp.eq.f32.partialorder %v1003_v35, inf  ;;  %v1009_v51 = vand.u32 2147483648, %v1003_v35  ;;  %vm1008_vm14 = vcmp.eq.f32.partialorder %v1003_v35, 0.0 }
 0xcb2   :  { %1573 = vmatmul.mubr.msk.f32.vlgmr.msra.gmra.mrb[4].mxu1 %vm710_vm7, %v782_v58  ;;  %vm943_vm7 = vcmask 64512  }
 0xcb3   :  { %1576 = vmatpush3.xpose.msk.msra.mxu1 %vm47_vm0, %v863_v12  ;;  %1577 = vmatprep.mubr.msk.f32.mxu1 %vm1821_vm2, %v1822_v9 }
 0xcb4   :  { %1580 = vmatprep.subr.mxu1 %v1822_v9 }
 0xcb6   :  { %1578 = vmatmul.mubr.msk.f32.vlgmr.msra.gmra.mrb[6].mxu1 %vm47_vm0, %v862_v6 }
 0xcb7   :  { %1582 = vmatprep.mubr.msk.f32.mxu1 %vm1821_vm2, %v1822_v9 }
 0xd85   :  { %v2237_v7 = vpop.f32.mrb[4].mxu1 }
 0xd86   :  { %v1014_v8 = vmul.f32 %v2237_v7, %v2237_v7  ;;  %v1574_v10 = vpop.f32.mrb[5].mxu1 }
 0xd88   :  { %v1015_v11 = vsel %vm47_vm0, %v1014_v8, 0.0 }
 0xd89   :  { %1016 = vadd.xlane.f32.xlu0 %v1015_v11  ;;  %v936_v13 = vpop.f32.mrb[6].mxu1 }
 0xd8a   :  { %v940_v15 = vmul.f32 50.0, %v936_v13  ;;  %v1579_v18 = vpop.f32.mrb[7].mxu1 }
 0xd8c   :  { %v944_v19 = vsel %vm943_vm7, %v940_v15, -inf  ;;  %v942_v39 = vsel %vm941_vm10, %v940_v15, 0.0 }
 0xd8d   :  { %945 = vmax.xlane.f32.xlu0 %v944_v19  ;;  %v966_v20 = vrot.slane %v944_v19, 4  ;;  %v956_v41 = vsel %vm943_vm7, %v942_v39, 0.0 }
 0xd8e   :  { %v985_v43 = vrot.slane %v956_v41, 4 }
 0xd8f   :  { %v967_v21 = vmax.f32 %v944_v19, %v966_v20 }
 0xd90   :  { %v986_v48 = vadd.f32 %v985_v43, %v956_v41 }
 0xd91   :  { %v968_v22 = vrot.slane %v967_v21, 2 }
 0xd92   :  { %v987_v5 = vrot.slane %v986_v48, 2 }
 0xd93   :  { %v969_v23 = vmax.f32 %v967_v21, %v968_v22 }
 0xd95   :  { %v970_v24 = vrot.slane %v969_v23, 1 }
 0xd97   :  { %v971_v25 = vmax.f32 %v969_v23, %v970_v24 }
 0xd99   :  { %v972_v26 = vsub.f32 %v940_v15, %v971_v25 }
 0xd9b   :  { %v973_v27 = vmul.f32 1.442695, %v972_v26 }
 0xd9d   :  { %1748 = vpow2.f32 %v973_v27 }
 0xd9e   :  { %1750 = vrsqrt.f32 %v1003_v35 }
 0xda7   :  { %v1749_v28 = vpop.eup %1748 }
 0xda8   :  { %v975_v29 = vsel %vm943_vm7, %v1749_v28, 0.0  ;;  %v1751_v55 = vpop.eup %1750 }
 0xda9   :  { %v976_v30 = vrot.slane %v975_v29, 4  ;;  %v1005_v49 = vmul.f32 %v1751_v55, %v1003_v35 }
 0xdab   :  { %v977_v32 = vadd.f32 %v976_v30, %v975_v29  ;;  %v1007_v50 = vsel %vm1006_vm11, %v1003_v35, %v1005_v49 }
 0xdac   :  { %v1010_v53 = vsel %vm1008_vm14, %v1009_v51, %v1007_v50 }
 0xdad   :  { %v978_v33 = vrot.slane %v977_v32, 2  ;;  %v1011_v61 = vmax.f32 %v1010_v53, 1e-12 }
 0xdaf   :  { %v979_v36 = vadd.f32 %v978_v33, %v977_v32 }
 0xdb1   :  { %v980_v38 = vrot.slane %v979_v36, 1 }
 0xdb3   :  { %v981_v40 = vadd.f32 %v980_v38, %v979_v36 }
 0xdb5   :  { %1752 = vlog2.f32 %v981_v40 }
 0xdbf   :  { %v1753_v54 = vpop.eup %1752 }
 0xdc0   :  { %v983_v60 = vmul.f32 0.6931472, %v1753_v54 }
 0xdc2   :  { %v984_v16 = vadd.f32 %v983_v60, %v971_v25 }
 0xe16   :  { %v1017_v42 = vpop.xlane.xlu0 %1016 }
 0xe17   :  { %v1018_v37 = vadd.f32 %v1017_v42, %v2152_v46  ;;  %v988_v46 = vadd.f32 %v987_v5, %v986_v48 }
 0xe19   :  { %1754 = vrsqrt.f32 %v1018_v37  ;;  %vm1021_vm1 = vcmp.eq.f32.partialorder %v1018_v37, inf  ;;  %v1024_v57 = vand.u32 2147483648, %v1018_v37  ;;  %vm1023_vm12 = vcmp.eq.f32.partialorder %v1018_v37, 0.0 }
 0xe1a   :  { %v946_v45 = vpop.xlane.xlu0 %945  ;;  %v989_v1 = vrot.slane %v988_v46, 1 }
 0xe1b   :  { %v947_v47 = vsub.f32 %v940_v15, %v946_v45 }
 0xe1c   :  { %v990_v58 = vadd.f32 %v989_v1, %v988_v46 }
 0xe1d   :  { %v948_v2 = vmul.f32 1.442695, %v947_v47 }
 0xe1e   :  { %v991_v12 = vsub.f32 %v984_v16, %v990_v58 }
 0xe1f   :  { %1756 = vpow2.f32 %v948_v2 }
 0xe20   :  { %v992_v6 = vsel %vm943_vm7, %v991_v12, 0.0 }
 0xe23   :  { %v1755_v52 = vpop.eup %1754 }
 0xe24   :  { %v1020_v56 = vmul.f32 %v1755_v52, %v1018_v37 }
 0xe26   :  { %v1022_v59 = vsel %vm1021_vm1, %v1018_v37, %v1020_v56 }
 0xe27   :  { %v1025_v63 = vsel %vm1023_vm12, %v1024_v57, %v1022_v59 }
 0xe28   :  { %v1026_v0 = vmax.f32 %v1025_v63, 1e-12 }
 0xe29   :  { %v1757_v3 = vpop.eup %1756 }
 0xe2a   :  { %1758 = vrcp.f32 %v1026_v0  ;;  %v950_v4 = vsel %vm943_vm7, %v1757_v3, 0.0 }
 0xe2b   :  { %1760 = vrcp.f32 %v1011_v61  ;;  %951 = vadd.xlane.f32.xlu0 %v950_v4 }
 0xe2f   :  { %957 = vadd.xlane.f32.xlu0 %v956_v41 }
 0xe33   :  { %993 = vadd.xlane.f32.xlu0 %v992_v6 }
 0xe34   :  { %v1759_v8 = vpop.eup %1758 }
 0xe35   :  { %v1761_v10 = vpop.eup %1760  ;;  %v1032_v11 = vmul.f32 %v1759_v8, %v2237_v7  ;;  %v1030_v15 = vmul.f32 %v1759_v8, %v2106_v31 }
 0xe36   :  { %v1031_v13 = vmul.f32 %v1761_v10, %v2150_v44  ;;  %v1029_v18 = vmul.f32 %v1761_v10, %v1896_v14 }
 0xe37   :  { %1581 = vmatpush3.xpose.msk.msra.mxu1 %vm47_vm0, %v1032_v11 }
 0xe38   :  { %1585 = vmatprep.subr.mxu1 %v1822_v9 }
 0xe3a   :  { %1583 = vmatmul.mubr.msk.f32.vlgmr.msra.gmra.mrb[8].mxu1 %vm47_vm0, %v1031_v13 }
 0xe3b   :  { %1586 = vmatpush3.xpose.msk.msra.mxu1 %vm47_vm0, %v1030_v15  ;;  %1587 = vmatprep.mubr.msk.f32.mxu1 %vm1821_vm2, %v1822_v9  ;;  %vm997_vm2 = vcmask 0  }
 0xe42   :  { %1588 = vmatmul.mubr.msk.f32.vlgmr.msra.gmra.mrb[8].mxu1 %vm47_vm0, %v1029_v18 }
 0xeb8   :  { %v952_v7 = vpop.xlane.xlu0 %951 }
 0xeb9   :  { %1762 = vlog2.f32 %v952_v7 }
 0xebc   :  { %v958_v21 = vpop.xlane.xlu0 %957 }
 0xec0   :  { %v994_v28 = vpop.xlane.xlu0 %993 }
 0xec3   :  { %v1763_v19 = vpop.eup %1762 }
 0xec4   :  { %v954_v20 = vmul.f32 0.6931472, %v1763_v19 }
 0xec6   :  { %v955_v44 = vadd.f32 %v954_v20, %v946_v45 }
 0xec8   :  { %v959_v22 = vsub.f32 %v955_v44, %v958_v21 }
 0xeca   :  { %v960_v23 = vrot.slane %v959_v22, 4 }
 0xecc   :  { %v961_v31 = vadd.f32 %v960_v23, %v959_v22 }
 0xece   :  { %v962_v24 = vrot.slane %v961_v31, 2 }
 0xed0   :  { %v963_v25 = vadd.f32 %v962_v24, %v961_v31 }
 0xed2   :  { %v964_v26 = vrot.slane %v963_v25, 1 }
 0xed4   :  { %v965_v27 = vadd.f32 %v964_v26, %v963_v25 }
 0xed6   :  { %v995_v29 = vadd.f32 %v994_v28, %v965_v27 }
 0xed8   :  { %v996_v9 = vmul.f32 0.0625, %v995_v29 }
 0xeda   :  { %998 = vst.msk [vmem:[#allocation2] sm:$0x1] %vm997_vm2, %v996_v9 }
 0xf15   :  { %v1181_v14 = vpop.f32.mrb[8].mxu1 }
 0xf16   :  { %v1185_v30 = vmul.f32 50.0, %v1181_v14  ;;  %v1589_v32 = vpop.f32.mrb[9].mxu1 }
 0xf18   :  { %v1187_v33 = vsel %vm943_vm7, %v1185_v30, -inf  ;;  %v1186_v2 = vsel %vm941_vm10, %v1185_v30, 0.0 }
 0xf19   :  { %1188 = vmax.xlane.f32.xlu1 %v1187_v33  ;;  %v1209_v34 = vrot.slane %v1187_v33, 4  ;;  %v1199_v5 = vsel %vm943_vm7, %v1186_v2, 0.0 }
 0xf1a   :  { %v1228_v54 = vrot.slane %v1199_v5, 4 }
 0xf1b   :  { %v1210_v35 = vmax.f32 %v1187_v33, %v1209_v34 }
 0xf1c   :  { %v1229_v53 = vadd.f32 %v1228_v54, %v1199_v5 }
 0xf1d   :  { %v1211_v36 = vrot.slane %v1210_v35, 2 }
 0xf1e   :  { %v1230_v46 = vrot.slane %v1229_v53, 2 }
 0xf1f   :  { %v1212_v38 = vmax.f32 %v1210_v35, %v1211_v36 }
 0xf20   :  { %v1231_v59 = vadd.f32 %v1230_v46, %v1229_v53 }
 0xf21   :  { %v1213_v39 = vrot.slane %v1212_v38, 1 }
 0xf22   :  { %v1232_v61 = vrot.slane %v1231_v59, 1 }
 0xf23   :  { %v1214_v40 = vmax.f32 %v1212_v38, %v1213_v39 }
 0xf24   :  { %v1233_v17 = vadd.f32 %v1232_v61, %v1231_v59 }
 0xf25   :  { %v1215_v41 = vsub.f32 %v1185_v30, %v1214_v40 }
 0xf27   :  { %v1216_v42 = vmul.f32 1.442695, %v1215_v41 }
 0xf29   :  { %1764 = vpow2.f32 %v1216_v42 }
 0xf33   :  { %v1765_v37 = vpop.eup %1764 }
 0xf34   :  { %v1218_v43 = vsel %vm943_vm7, %v1765_v37, 0.0 }
 0xf35   :  { %v1219_v55 = vrot.slane %v1218_v43, 4 }
 0xf37   :  { %v1220_v45 = vadd.f32 %v1219_v55, %v1218_v43 }
 0xf39   :  { %v1221_v47 = vrot.slane %v1220_v45, 2 }
 0xf3b   :  { %v1222_v48 = vadd.f32 %v1221_v47, %v1220_v45 }
 0xf3d   :  { %v1223_v49 = vrot.slane %v1222_v48, 1 }
 0xf3f   :  { %v1224_v50 = vadd.f32 %v1223_v49, %v1222_v48 }
 0xf41   :  { %1766 = vlog2.f32 %v1224_v50 }
 0xf4b   :  { %v1767_v57 = vpop.eup %1766 }
 0xf4c   :  { %v1226_v60 = vmul.f32 0.6931472, %v1767_v57 }
 0xf4e   :  { %v1227_v62 = vadd.f32 %v1226_v60, %v1214_v40 }
 0xf50   :  { %v1234_v1 = vsub.f32 %v1227_v62, %v1233_v17 }
 0xf52   :  { %v1235_v3 = vsel %vm943_vm7, %v1234_v1, 0.0 }
 0xfa6   :  { %v1189_v51 = vpop.xlane.xlu1 %1188 }
 0xfa7   :  { %v1190_v52 = vsub.f32 %v1185_v30, %v1189_v51 }
 0xfa9   :  { %v1191_v56 = vmul.f32 1.442695, %v1190_v52 }
 0xfab   :  { %1768 = vpow2.f32 %v1191_v56 }
 0xfb5   :  { %v1769_v63 = vpop.eup %1768 }
 0xfb6   :  { %v1193_v0 = vsel %vm943_vm7, %v1769_v63, 0.0 }
 0xfb7   :  { %1194 = vadd.xlane.f32.xlu1 %v1193_v0 }
 0xfbb   :  { %1200 = vadd.xlane.f32.xlu1 %v1199_v5 }
 0xfbf   :  { %1236 = vadd.xlane.f32.xlu1 %v1235_v3 }
 0xfc0   :  { %1783 = shalt.err (!%p1780_p4)
}
 0xfc1   :  { %s1784_s21 = scalar_lea.hbm %s2303_s4, 16 }
 0xfc2   :  { %p1785_p5 = scmp.ne.s32.totalorder %s2303_s4, %s1784_s21  ;;  %p1788_p6 = scmp.lt.u32.totalorder %s1784_s21, %s2303_s4 }
 0xfc4   :  { %p1790_p7 = pnand %p1788_p6, %p1785_p5 }
 0xfc6   :  { %1793 = shalt.err (!%p1790_p7)
}
 0xfc7   :  { %1250 = dma.vmem_to_hbm [thread:$0]  %s1248_s3, 16, %s2303_s4, [#allocation3]  }
 0xfc8   :  { %s1827_s27 = smov [#allocation4]  }
 0xfc9   :  { %s1257_s28 = sshll.u32 %s1827_s27, 4  ;;  %s1258_s28 = int_to_ptr.vmem [resolvable:$true] %s1257_s28 }
 0xfca   :  { %s1794_s4 = scalar_lea.vmem %s1258_s28, 16  ;;  %s1798_s29 = scalar_lea.vmem %s1258_s28, 32 }
 0xfcb   :  { %p1795_p8 = scmp.ne.s32.totalorder %s1258_s28, %s1794_s4  ;;  %p1799_p9 = scmp.lt.s32.totalorder %s1258_s28, %s1258_s28 }
 0xfcc   :  { %p1800_p10 = scmp.lt.s32.totalorder %s1798_s29, %s1794_s4 }
 0xfce   :  { %p1801_p11 = por %p1800_p10, %p1799_p9 }
 0xfd0   :  { %p1802_p12 = pnand %p1801_p11, %p1795_p8 }
0x1044   :  { %v1195_v4 = vpop.xlane.xlu1 %1194 }
0x1045   :  { %1770 = vlog2.f32 %v1195_v4 }
0x1048   :  { %v1201_v6 = vpop.xlane.xlu1 %1200 }
0x104c   :  { %v1237_v19 = vpop.xlane.xlu1 %1236 }
0x104f   :  { %v1771_v16 = vpop.eup %1770 }
0x1050   :  { %v1197_v58 = vmul.f32 0.6931472, %v1771_v16 }
0x1052   :  { %v1198_v12 = vadd.f32 %v1197_v58, %v1189_v51 }
0x1054   :  { %v1202_v8 = vsub.f32 %v1198_v12, %v1201_v6 }
0x1056   :  { %v1203_v10 = vrot.slane %v1202_v8, 4 }
0x1058   :  { %v1204_v11 = vadd.f32 %v1203_v10, %v1202_v8 }
0x105a   :  { %v1205_v13 = vrot.slane %v1204_v11, 2 }
0x105c   :  { %v1206_v15 = vadd.f32 %v1205_v13, %v1204_v11 }
0x105e   :  { %v1207_v18 = vrot.slane %v1206_v15, 1 }
0x1060   :  { %v1208_v7 = vadd.f32 %v1207_v18, %v1206_v15 }
0x1062   :  { %v1238_v20 = vadd.f32 %v1237_v19, %v1208_v7 }
0x1064   :  { %v1239_v44 = vmul.f32 0.0625, %v1238_v20 }
0x1066   :  { %1240 = vst.msk [vmem:[#allocation4] sm:$0x1] %vm997_vm2, %v1239_v44 }
0x1067   :  { %1805 = shalt.err (!%p1802_p12)
}
0x1068   :  { %s1806_s0 = scalar_lea.hbm %s2304_s5, 16 }
0x1069   :  { %p1807_p13 = scmp.ne.s32.totalorder %s2304_s5, %s1806_s0  ;;  %p1810_p0 = scmp.lt.u32.totalorder %s1806_s0, %s2304_s5 }
0x106b   :  { %p1812_p1 = pnand %p1810_p0, %p1807_p13 }
0x106d   :  { %1815 = shalt.err (!%p1812_p1)
}
0x106e   :  { %1260 = dma.vmem_to_hbm [thread:$0]  %s1258_s28, 16, %s2304_s5, [#allocation5]  }
0x106f   :  { %1816 = dma.done.wait [#allocation3], 16  }
0x1070   :  { %1817 = vsyncadd [#allocation3], 4294967280 }
0x1071   :  { %1818 = dma.done.wait [#allocation5], 16  }
0x1072   :  { %1819 = vsyncadd [#allocation5], 4294967280 }
0x1073   :  { %1267 = vsyncpa [#allocation3], 1 }
0x1074   :  { %1268 = vsyncpa [#allocation5], 1 }

</bundles_post_ra>
